<compile_context>
chip_gen: v7x
topology: tpu7x:2x2x1
jax: 0.10.0
libtpu: 0.0.40
codegen_flags: <defaults>
</compile_context>

<pallas_src>
import jax
import jax.numpy as jnp
from jax.experimental import pallas as pl
from jax.experimental.pallas import tpu as pltpu


# ----------------------------------------------------------------------------
# Fused Pallas kernel: three 1x1-conv (matmul) + bias + ReLU stages
# Blocks: x (1, c_in, tile_L), weights (c_out, c_in), biases (c_out, 1),
# output (1, c_out, tile_L).  All intermediates stay in vregs / VMEM.
# ----------------------------------------------------------------------------
def _down_block_kernel(x_ref, w0_ref, b0_ref, w1_ref, b1_ref, w2_ref, b2_ref,
                       o_ref):
    x = x_ref[0]                                               # (c_in, tile_L)

    h = jnp.dot(w0_ref[...], x.astype(w0_ref.dtype),
                preferred_element_type=jnp.float32)
    h = jnp.maximum(h + b0_ref[...], 0.0)                      # (128, tile_L)

    h = jnp.dot(w1_ref[...], h.astype(w1_ref.dtype),
                preferred_element_type=jnp.float32)
    h = jnp.maximum(h + b1_ref[...], 0.0)                      # (256, tile_L)

    h = jnp.dot(w2_ref[...], h.astype(w2_ref.dtype),
                preferred_element_type=jnp.float32)
    h = jnp.maximum(h + b2_ref[...], 0.0)                      # (128, tile_L)

    o_ref[0] = h.astype(o_ref.dtype)


# ----------------------------------------------------------------------------
# Wrapper: metadata-only reshape + single fused pallas_call (no transposes,
# no padding copies).
# ----------------------------------------------------------------------------
def down_block_forward(x, params, up_ratio=4, tile_l=1024):
    """x: (B, C, N) array.  params: [(w, b)] x 3 with w = (c_out, c_in)."""
    (w0, b0), (w1, b1), (w2, b2) = params
    B, C, N = x.shape
    assert N % up_ratio == 0, "spatial dim must be divisible by up_ratio"
    c_in = C * up_ratio
    L = N // up_ratio
    c_mid0, c_mid1, c_out = w0.shape[0], w1.shape[0], w2.shape[0]
    assert w0.shape == (c_mid0, c_in)

    # PyTorch: net.reshape(B, C*up_ratio, -1) -- row-major, metadata-only.
    net = x.reshape(B, c_in, L)

    # Lane-axis tile: full L when small, else a multiple of 128 (lane-dense).
    if L <= tile_l:
        tile = L
    else:
        tile = max(128, (tile_l // 128) * 128)
    grid = (B, pl.cdiv(L, tile))

    # Advisory cost hint for XLA's scheduler around the custom call.
    itemsize = jnp.dtype(x.dtype).itemsize
    m = B * L
    flops = 2 * m * (c_in * c_mid0 + c_mid0 * c_mid1 + c_mid1 * c_out)
    w_bytes = sum(int(w.size) * jnp.dtype(w.dtype).itemsize
                  + int(b.size) * jnp.dtype(b.dtype).itemsize
                  for (w, b) in params)
    cost = pl.CostEstimate(flops=flops, transcendentals=0,
                           bytes_accessed=m * (c_in + c_out) * itemsize + w_bytes)

    out = pl.pallas_call(
        _down_block_kernel,
        out_shape=jax.ShapeDtypeStruct((B, c_out, L), x.dtype),
        grid_spec=pltpu.PrefetchScalarGridSpec(
            num_scalar_prefetch=0,
            grid=grid,
            in_specs=[
                # activations: tiled over (batch, L-blocks)
                pl.BlockSpec((1, c_in, tile), lambda b, j: (b, 0, j)),
                # weights / biases: full blocks, VMEM-resident across the grid
                pl.BlockSpec(w0.shape, lambda b, j: (0, 0)),
                pl.BlockSpec((c_mid0, 1), lambda b, j: (0, 0)),
                pl.BlockSpec(w1.shape, lambda b, j: (0, 0)),
                pl.BlockSpec((c_mid1, 1), lambda b, j: (0, 0)),
                pl.BlockSpec(w2.shape, lambda b, j: (0, 0)),
                pl.BlockSpec((c_out, 1), lambda b, j: (0, 0)),
            ],
            out_specs=pl.BlockSpec((1, c_out, tile), lambda b, j: (b, 0, j)),
        ),
        compiler_params=pltpu.CompilerParams(
            dimension_semantics=("parallel", "parallel"),
            vmem_limit_bytes=32 * 1024 * 1024,
        ),
        cost_estimate=cost,
    )(net, w0, b0.reshape(-1, 1), w1, b1.reshape(-1, 1), w2, b2.reshape(-1, 1))

    return out                                  # (B, 128, L), channels-first


# ----------------------------------------------------------------------------
# Parameter init (PyTorch Conv1d layout: weight (out, in), bias (out,))
# Pass dtype=jnp.bfloat16 for the bf16 MXU path on v5e/v6e/v7x.
# ----------------------------------------------------------------------------
def init_down_block_params(key, up_ratio=4, in_channels=128,
                           dtype=jnp.float32):
    layer_dims = [
        (in_channels * up_ratio, in_channels),   # conv:  512 -> 128
        (in_channels, 256),                      # conv1: 128 -> 256
        (256, 128),                              # conv2: 256 -> 128
    ]
    params = []
    for c_in, c_out in layer_dims:
        key, kw, kb = jax.random.split(key, 3)
        bound = 1.0 / float(c_in) ** 0.5         # PyTorch conv init (k=1)
        w = jax.random.uniform(kw, (c_out, c_in), dtype, -bound, bound)
        b = jax.random.uniform(kb, (c_out,), dtype, -bound, bound)
        params.append((w, b))
    return params


# ----------------------------------------------------------------------------
# Pure-JAX reference (mirrors the PyTorch forward) for a correctness check
# ----------------------------------------------------------------------------
def down_block_reference(x, params, up_ratio=4):
    B, C, N = x.shape
    net = x.reshape(B, C * up_ratio, -1)
    for (w, b) in params:
        net = jnp.einsum("oi,bil->bol", w, net) + b[None, :, None]
        net = jnp.maximum(net, 0.0)
    return net


if __name__ == "__main__":
    key = jax.random.PRNGKey(0)
    k_in, k_params = jax.random.split(key)

    up_ratio = 4
    in_channels = 128                       # module defaults
    batch = 2
    n_points = 32                           # small spatial size (L = 8)

    x = jax.random.normal(k_in, (batch, in_channels, n_points), jnp.float32)
    params = init_down_block_params(k_params, up_ratio, in_channels)

    out = down_block_forward(x, params, up_ratio=up_ratio)
    out = jax.block_until_ready(out)

    ref = down_block_reference(x, params, up_ratio=up_ratio)
    assert out.shape == (batch, 128, n_points // up_ratio), out.shape
    assert jnp.allclose(out, ref, atol=1e-4, rtol=1e-4)

    print("KERNEL_OK")
</pallas_src>

<mosaic_0001>
module attributes {stable_mosaic.version = 11 : i64} {
  func.func @_down_block_kernel(%arg0: i32, %arg1: i32, %arg2: memref<1x512x8xf32, #tpu.memory_space<vmem>>, %arg3: memref<128x512xf32, #tpu.memory_space<vmem>>, %arg4: memref<128x1xf32, #tpu.memory_space<vmem>>, %arg5: memref<256x128xf32, #tpu.memory_space<vmem>>, %arg6: memref<256x1xf32, #tpu.memory_space<vmem>>, %arg7: memref<128x256xf32, #tpu.memory_space<vmem>>, %arg8: memref<128x1xf32, #tpu.memory_space<vmem>>, %arg9: memref<1x128x8xf32, #tpu.memory_space<vmem>>) attributes {dimension_semantics = [#tpu.dimension_semantics<parallel>, #tpu.dimension_semantics<parallel>], iteration_bounds = array<i64: 2, 1>, scalar_prefetch = 0 : i64, scratch_operands = 0 : i64, tpu.core_type = #tpu.core_type<tc>, window_params = [{transform_indices = @transform_0, window_bounds = array<i64: 1, 512, 8>}, {pipeline_mode = #tpu.pipeline_mode<synchronous>, transform_indices = @transform_1, window_bounds = array<i64: 128, 512>}, {pipeline_mode = #tpu.pipeline_mode<synchronous>, transform_indices = @transform_2, window_bounds = array<i64: 128, 1>}, {pipeline_mode = #tpu.pipeline_mode<synchronous>, transform_indices = @transform_3, window_bounds = array<i64: 256, 128>}, {pipeline_mode = #tpu.pipeline_mode<synchronous>, transform_indices = @transform_4, window_bounds = array<i64: 256, 1>}, {pipeline_mode = #tpu.pipeline_mode<synchronous>, transform_indices = @transform_5, window_bounds = array<i64: 128, 256>}, {pipeline_mode = #tpu.pipeline_mode<synchronous>, transform_indices = @transform_6, window_bounds = array<i64: 128, 1>}, {transform_indices = @transform_7, window_bounds = array<i64: 1, 128, 8>}]} {
    %c0 = arith.constant 0 : index
    %c0_0 = arith.constant 0 : index
    %c0_1 = arith.constant 0 : index
    %0 = vector.load %arg2[%c0, %c0_0, %c0_1] : memref<1x512x8xf32, #tpu.memory_space<vmem>>, vector<1x512x8xf32>
    %1 = vector.shape_cast %0 : vector<1x512x8xf32> to vector<512x8xf32>
    %c0_2 = arith.constant 0 : index
    %c0_3 = arith.constant 0 : index
    %2 = vector.load %arg3[%c0_2, %c0_3] : memref<128x512xf32, #tpu.memory_space<vmem>>, vector<128x512xf32>
    %cst = arith.constant dense<0.000000e+00> : vector<128x8xf32>
    %3 = tpu.matmul %2, %1, %cst {dimension_numbers = #tpu.dot_dimension_numbers<[1], [0], [0], [1], [0, 0, 1, 1], [], []>} : vector<128x512xf32>, vector<512x8xf32>, vector<128x8xf32> -> vector<128x8xf32>
    %c0_4 = arith.constant 0 : index
    %c0_5 = arith.constant 0 : index
    %4 = vector.load %arg4[%c0_4, %c0_5] : memref<128x1xf32, #tpu.memory_space<vmem>>, vector<128x1xf32>
    %5 = vector.broadcast %4 : vector<128x1xf32> to vector<128x8xf32>
    %6 = arith.addf %3, %5 : vector<128x8xf32>
    %cst_6 = arith.constant 0.000000e+00 : f32
    %7 = vector.broadcast %cst_6 : f32 to vector<128x8xf32>
    %8 = arith.maximumf %6, %7 : vector<128x8xf32>
    %c0_7 = arith.constant 0 : index
    %c0_8 = arith.constant 0 : index
    %9 = vector.load %arg5[%c0_7, %c0_8] : memref<256x128xf32, #tpu.memory_space<vmem>>, vector<256x128xf32>
    %cst_9 = arith.constant dense<0.000000e+00> : vector<256x8xf32>
    %10 = tpu.matmul %9, %8, %cst_9 {dimension_numbers = #tpu.dot_dimension_numbers<[1], [0], [0], [1], [0, 0, 1, 1], [], []>} : vector<256x128xf32>, vector<128x8xf32>, vector<256x8xf32> -> vector<256x8xf32>
    %c0_10 = arith.constant 0 : index
    %c0_11 = arith.constant 0 : index
    %11 = vector.load %arg6[%c0_10, %c0_11] : memref<256x1xf32, #tpu.memory_space<vmem>>, vector<256x1xf32>
    %12 = vector.broadcast %11 : vector<256x1xf32> to vector<256x8xf32>
    %13 = arith.addf %10, %12 : vector<256x8xf32>
    %cst_12 = arith.constant 0.000000e+00 : f32
    %14 = vector.broadcast %cst_12 : f32 to vector<256x8xf32>
    %15 = arith.maximumf %13, %14 : vector<256x8xf32>
    %c0_13 = arith.constant 0 : index
    %c0_14 = arith.constant 0 : index
    %16 = vector.load %arg7[%c0_13, %c0_14] : memref<128x256xf32, #tpu.memory_space<vmem>>, vector<128x256xf32>
    %cst_15 = arith.constant dense<0.000000e+00> : vector<128x8xf32>
    %17 = tpu.matmul %16, %15, %cst_15 {dimension_numbers = #tpu.dot_dimension_numbers<[1], [0], [0], [1], [0, 0, 1, 1], [], []>} : vector<128x256xf32>, vector<256x8xf32>, vector<128x8xf32> -> vector<128x8xf32>
    %c0_16 = arith.constant 0 : index
    %c0_17 = arith.constant 0 : index
    %18 = vector.load %arg8[%c0_16, %c0_17] : memref<128x1xf32, #tpu.memory_space<vmem>>, vector<128x1xf32>
    %19 = vector.broadcast %18 : vector<128x1xf32> to vector<128x8xf32>
    %20 = arith.addf %17, %19 : vector<128x8xf32>
    %cst_18 = arith.constant 0.000000e+00 : f32
    %21 = vector.broadcast %cst_18 : f32 to vector<128x8xf32>
    %22 = arith.maximumf %20, %21 : vector<128x8xf32>
    %c0_19 = arith.constant 0 : index
    %c0_20 = arith.constant 0 : index
    %c0_21 = arith.constant 0 : index
    %23 = vector.load %arg9[%c0_19, %c0_20, %c0_21] : memref<1x128x8xf32, #tpu.memory_space<vmem>>, vector<1x128x8xf32>
    %24 = vector.shape_cast %23 : vector<1x128x8xf32> to vector<128x8xf32>
    %25 = vector.shape_cast %22 : vector<128x8xf32> to vector<1x128x8xf32>
    tpu.vector_store %arg9[%c0_19, %c0_20, %c0_21], %25 {strides = array<i32>} : memref<1x128x8xf32, #tpu.memory_space<vmem>>, vector<1x128x8xf32>,
    return
  }
  func.func @transform_0(%arg0: i32, %arg1: i32) -> (i32, i32, i32) {
    %c0_i32 = arith.constant 0 : i32
    %c0_i32_0 = arith.constant 0 : i32
    return %arg0, %c0_i32, %arg1 : i32, i32, i32
  }
  func.func @transform_1(%arg0: i32, %arg1: i32) -> (i32, i32) {
    %c0_i32 = arith.constant 0 : i32
    %c0_i32_0 = arith.constant 0 : i32
    %c0_i32_1 = arith.constant 0 : i32
    return %c0_i32, %c0_i32_0 : i32, i32
  }
  func.func @transform_2(%arg0: i32, %arg1: i32) -> (i32, i32) {
    %c0_i32 = arith.constant 0 : i32
    %c0_i32_0 = arith.constant 0 : i32
    %c0_i32_1 = arith.constant 0 : i32
    return %c0_i32, %c0_i32_0 : i32, i32
  }
  func.func @transform_3(%arg0: i32, %arg1: i32) -> (i32, i32) {
    %c0_i32 = arith.constant 0 : i32
    %c0_i32_0 = arith.constant 0 : i32
    %c0_i32_1 = arith.constant 0 : i32
    return %c0_i32, %c0_i32_0 : i32, i32
  }
  func.func @transform_4(%arg0: i32, %arg1: i32) -> (i32, i32) {
    %c0_i32 = arith.constant 0 : i32
    %c0_i32_0 = arith.constant 0 : i32
    %c0_i32_1 = arith.constant 0 : i32
    return %c0_i32, %c0_i32_0 : i32, i32
  }
  func.func @transform_5(%arg0: i32, %arg1: i32) -> (i32, i32) {
    %c0_i32 = arith.constant 0 : i32
    %c0_i32_0 = arith.constant 0 : i32
    %c0_i32_1 = arith.constant 0 : i32
    return %c0_i32, %c0_i32_0 : i32, i32
  }
  func.func @transform_6(%arg0: i32, %arg1: i32) -> (i32, i32) {
    %c0_i32 = arith.constant 0 : i32
    %c0_i32_0 = arith.constant 0 : i32
    %c0_i32_1 = arith.constant 0 : i32
    return %c0_i32, %c0_i32_0 : i32, i32
  }
  func.func @transform_7(%arg0: i32, %arg1: i32) -> (i32, i32, i32) {
    %c0_i32 = arith.constant 0 : i32
    %c0_i32_0 = arith.constant 0 : i32
    return %arg0, %c0_i32, %arg1 : i32, i32, i32
  }
}

</mosaic_0001>

<bundles_post_ra>
// kernel: tpu_custom_call.1
= control target key start
LH: loop header
LB: loop body
LE: loop exit
PB: predicated region body
PF: predicated region fallthrough
CT: control target
= control target key end

     0   :  { %s2311_s24 = smov 0   ;;  %s2313_s25 = smov 0   ;;  %s3096_s0 = inlined_call_operand.vmem [shape: f32[2,512,8], index: 0, kind: input, shape index: {}]   ;;  %s3097_s1 = inlined_call_operand.vmem [shape: f32[128,512], index: 1, kind: input, shape index: {}]   ;;  %s3098_s2 = inlined_call_operand.vmem [shape: f32[128,1], index: 2, kind: input, shape index: {}]   ;;  %s3099_s3 = inlined_call_operand.vmem [shape: f32[256,128], index: 3, kind: input, shape index: {}]   ;;  %s3100_s4 = inlined_call_operand.vmem [shape: f32[256,1], index: 4, kind: input, shape index: {}]   ;;  %s3101_s5 = inlined_call_operand.vmem [shape: f32[128,256], index: 5, kind: input, shape index: {}]   ;;  %s3102_s6 = inlined_call_operand.vmem [shape: f32[128,1], index: 6, kind: input, shape index: {}]   ;;  %s3103_s7 = inlined_call_operand.vmem [shape: f32[2,128,8], index: 7, kind: output, shape index: {}]  }
   0x1   :  { %s2315_s26 = smov 0  }
   0x2 LB: > { %s29_s27 = sadd.s32 1, %s2264_s25  ;;  %p1714_p0 = scmp.ge.s32.totalorder %s2268_s26, 1  ;;  %s2268_s26 = sphi %s2315_s26, %s17_s26   ;;  %s2264_s25 = sphi %s2313_s25, %s3105_s25   ;;  %s2260_s24 = sphi %s2311_s24, %s3104_s24  }
   0x3   : > { %p31_p1 = scmp.ge.s32.totalorder %s29_s27, 2  ;;  %p256_p2 = scmp.lt.s32.totalorder %s2268_s26, 3 }
   0x5   : > { %s3107_s27 = smov (%p31_p1, %s29_s27), 0  ;;  %p257_p3 = pnand %p1714_p0, %p256_p2 }
   0x6   : > { %p294_p4 = scmp.lt.s32.totalorder (!%p257_p3), %s2260_s24, 1  ;;  %v438_v0 = vld [vmem:[%s3098_s2] sm:$0xff] (!%p257_p3)  ;;  %v440_v1 = vld [vmem:[%s3098_s2 + $0x10] sm:$0xff] (!%p257_p3)  ;;  %v2270_v2 = vmov (!%p257_p3), 0   ;;  %v375_v3 = vld [vmem:[%s3097_s1 + $0x8] sm:$0xff] (!%p257_p3)  ;;  %vm1610_vm0 = vcmask (!%p257_p3), 64512  }
   0x7   : > { %260 = sbr.rel (%p257_p3) target bundleno = 902 (0x386), region = 48  ;;  %2244 = vset.pattern.permute.xlu0 (!%p257_p3), %v2270_v2  ;;  %2245 = vset.pattern.permute.xlu1 (!%p257_p3), %v2270_v2  ;;  %v377_v4 = vld [vmem:[%s3097_s1 + $0x18] sm:$0xff] (!%p257_p3)  ;;  %v439_v5 = vld [vmem:[%s3098_s2 + $0x8] sm:$0xff] (!%p257_p3)  ;;  %v442_v10 = vld [vmem:[%s3098_s2 + $0x20] sm:$0xff] (!%p257_p3) }
   0x8   : > { %456 = vperm.xlu0 (!%p257_p3), %2244, %v438_v0   ;;  %466 = vperm.xlu1 (!%p257_p3), %2245, %v440_v1   ;;  %v441_v6 = vld [vmem:[%s3098_s2 + $0x18] sm:$0xff] (!%p257_p3)  ;;  %v443_v15 = vld [vmem:[%s3098_s2 + $0x28] sm:$0xff] (!%p257_p3)  ;;  %v444_v34 = vld [vmem:[%s3098_s2 + $0x30] sm:$0xff] (!%p257_p3) }
   0x9   : > { %598 = vmatprep.mubr.f32.mxu0 (!%p257_p3), %v375_v3  ;;  %743 = vmatprep.mubr.f32.mxu1 (!%p257_p3), %v377_v4  ;;  %v445_v40 = vld [vmem:[%s3098_s2 + $0x38] sm:$0xff] (!%p257_p3)  ;;  %v446_v59 = vld [vmem:[%s3098_s2 + $0x40] sm:$0xff] (!%p257_p3) }
   0xc   : > { %461 = vperm.xlu0 (!%p257_p3), %2244, %v439_v5   ;;  %471 = vperm.xlu1 (!%p257_p3), %2245, %v441_v6  }
   0xe   : > { %s3109_s24 = smov (!%p294_p4, %s2260_s24), 1 }
   0xf   : > { %s1721_s17 = sshll.u32 %s3109_s24, 9  ;;  %s1722_s13 = sshll.u32 %s3109_s24, 7 }
  0x10   : > { %s2353_s20 = scalar_lea.vmem %s3096_s0, %s1721_s17  ;;  %476 = vperm.xlu0 %2244, %v442_v10   ;;  %481 = vperm.xlu1 %2245, %v443_v15   ;;  %s3053_s16 = scalar_lea.vmem %s3103_s7, %s1722_s13 }
  0x11   : > { %v326_v7 = vld [vmem:[%s2353_s20 + $0x80] sm:$0xff]  ;;  %v327_v8 = vld [vmem:[%s2353_s20 + $0x88] sm:$0xff]  ;;  %v328_v20 = vld [vmem:[%s2353_s20 + $0x90] sm:$0xff] }
  0x12   : > { %v310_v9 = vld [vmem:[%s2353_s20] sm:$0xff]  ;;  %v2091_v11 = vpack.c.bf16 %v327_v8, %v326_v7  ;;  %v311_v12 = vld [vmem:[%s2353_s20 + $0x8] sm:$0xff]  ;;  %v329_v22 = vld [vmem:[%s2353_s20 + $0x98] sm:$0xff] }
  0x13   : > { %v358_v13 = vld [vmem:[%s2353_s20 + $0x180] sm:$0xff]  ;;  %v359_v14 = vld [vmem:[%s2353_s20 + $0x188] sm:$0xff]  ;;  %v2093_v16 = vpack.c.bf16 %v311_v12, %v310_v9  ;;  %v312_v23 = vld [vmem:[%s2353_s20 + $0x10] sm:$0xff]  ;;  %v2095_v25 = vpack.c.bf16 %v329_v22, %v328_v20 }
  0x14   : > { %v2123_v17 = vpack.c.bf16 %v359_v14, %v358_v13  ;;  %v342_v18 = vld [vmem:[%s2353_s20 + $0x100] sm:$0xff]  ;;  %v343_v19 = vld [vmem:[%s2353_s20 + $0x108] sm:$0xff]  ;;  %2092 = vmatprep.subr.bf16.mxu0 %v2091_v11  ;;  %v313_v24 = vld [vmem:[%s2353_s20 + $0x18] sm:$0xff]  ;;  %486 = vperm.xlu0 %2244, %v444_v34  }
  0x15   : > { %v2125_v21 = vpack.c.bf16 %v343_v19, %v342_v18  ;;  %2094 = vmatpush3.bf16.msra.mxu0 %v2093_v16  ;;  %v2097_v26 = vpack.c.bf16 %v313_v24, %v312_v23  ;;  %v360_v27 = vld [vmem:[%s2353_s20 + $0x190] sm:$0xff]  ;;  %v361_v28 = vld [vmem:[%s2353_s20 + $0x198] sm:$0xff]  ;;  %v330_v32 = vld [vmem:[%s2353_s20 + $0xa0] sm:$0xff]  ;;  %491 = vperm.xlu1 %2245, %v445_v40  }
  0x16   : > { %2124 = vmatprep.subr.bf16.mxu1 %v2123_v17  ;;  %v344_v29 = vld [vmem:[%s2353_s20 + $0x110] sm:$0xff]  ;;  %v2127_v30 = vpack.c.bf16 %v361_v28, %v360_v27  ;;  %v345_v31 = vld [vmem:[%s2353_s20 + $0x118] sm:$0xff]  ;;  %v331_v33 = vld [vmem:[%s2353_s20 + $0xa8] sm:$0xff]  ;;  %2096 = vmatprep.subr.bf16.mxu0 %v2095_v25 }
  0x17   : > { %2126 = vmatpush3.bf16.msra.mxu1 %v2125_v21  ;;  %v2129_v35 = vpack.c.bf16 %v345_v31, %v344_v29  ;;  %v2099_v36 = vpack.c.bf16 %v331_v33, %v330_v32  ;;  %v314_v37 = vld [vmem:[%s2353_s20 + $0x20] sm:$0xff]  ;;  %v315_v38 = vld [vmem:[%s2353_s20 + $0x28] sm:$0xff]  ;;  %v332_v46 = vld [vmem:[%s2353_s20 + $0xb0] sm:$0xff] }
  0x18   : > { %v362_v39 = vld [vmem:[%s2353_s20 + $0x1a0] sm:$0xff]  ;;  %2128 = vmatprep.subr.bf16.mxu1 %v2127_v30  ;;  %v363_v41 = vld [vmem:[%s2353_s20 + $0x1a8] sm:$0xff]  ;;  %v2101_v44 = vpack.c.bf16 %v315_v38, %v314_v37  ;;  %v333_v47 = vld [vmem:[%s2353_s20 + $0xb8] sm:$0xff]  ;;  %496 = vperm.xlu0 %2244, %v446_v59  }
  0x19   : > { %v346_v42 = vld [vmem:[%s2353_s20 + $0x120] sm:$0xff]  ;;  %v347_v43 = vld [vmem:[%s2353_s20 + $0x128] sm:$0xff]  ;;  %2098 = vmatpush3.bf16.msra.mxu0 %v2097_v26  ;;  %v2131_v45 = vpack.c.bf16 %v363_v41, %v362_v39  ;;  %v316_v48 = vld [vmem:[%s2353_s20 + $0x30] sm:$0xff]  ;;  %v2103_v50 = vpack.c.bf16 %v333_v47, %v332_v46 }
  0x1a   : > { %2100 = vmatprep.subr.bf16.mxu0 %v2099_v36  ;;  %v2133_v49 = vpack.c.bf16 %v347_v43, %v346_v42  ;;  %v317_v51 = vld [vmem:[%s2353_s20 + $0x38] sm:$0xff]  ;;  %v364_v52 = vld [vmem:[%s2353_s20 + $0x1b0] sm:$0xff]  ;;  %v334_v57 = vld [vmem:[%s2353_s20 + $0xc0] sm:$0xff] }
  0x1b   : > { %2130 = vmatpush3.bf16.msra.mxu1 %v2129_v35  ;;  %v365_v53 = vld [vmem:[%s2353_s20 + $0x1b8] sm:$0xff]  ;;  %v348_v55 = vld [vmem:[%s2353_s20 + $0x130] sm:$0xff]  ;;  %v335_v58 = vld [vmem:[%s2353_s20 + $0xc8] sm:$0xff]  ;;  %v2105_v60 = vpack.c.bf16 %v317_v51, %v316_v48 }
  0x1c   : > { %2132 = vmatprep.subr.bf16.mxu1 %v2131_v45  ;;  %v2135_v54 = vpack.c.bf16 %v365_v53, %v364_v52  ;;  %v349_v56 = vld [vmem:[%s2353_s20 + $0x138] sm:$0xff]  ;;  %v366_v61 = vld [vmem:[%s2353_s20 + $0x1c0] sm:$0xff]  ;;  %v367_v62 = vld [vmem:[%s2353_s20 + $0x1c8] sm:$0xff]  ;;  %v2107_v0 = vpack.c.bf16 %v335_v58, %v334_v57 }
  0x1d   : > { %2102 = vmatpush3.bf16.msra.mxu0 %v2101_v44  ;;  %v2137_v63 = vpack.c.bf16 %v349_v56, %v348_v55  ;;  %v318_v1 = vld [vmem:[%s2353_s20 + $0x40] sm:$0xff]  ;;  %v319_v2 = vld [vmem:[%s2353_s20 + $0x48] sm:$0xff]  ;;  %v2139_v4 = vpack.c.bf16 %v367_v62, %v366_v61  ;;  %v336_v6 = vld [vmem:[%s2353_s20 + $0xd0] sm:$0xff] }
  0x1e   : > { %2104 = vmatprep.subr.bf16.mxu0 %v2103_v50  ;;  %v350_v3 = vld [vmem:[%s2353_s20 + $0x140] sm:$0xff]  ;;  %v351_v5 = vld [vmem:[%s2353_s20 + $0x148] sm:$0xff]  ;;  %v337_v7 = vld [vmem:[%s2353_s20 + $0xd8] sm:$0xff]  ;;  %v2109_v10 = vpack.c.bf16 %v319_v2, %v318_v1 }
  0x1f   : > { %2134 = vmatpush3.bf16.msra.mxu1 %v2133_v49  ;;  %v368_v8 = vld [vmem:[%s2353_s20 + $0x1d0] sm:$0xff]  ;;  %v369_v9 = vld [vmem:[%s2353_s20 + $0x1d8] sm:$0xff]  ;;  %v2141_v11 = vpack.c.bf16 %v351_v5, %v350_v3  ;;  %v2111_v12 = vpack.c.bf16 %v337_v7, %v336_v6  ;;  %v338_v18 = vld [vmem:[%s2353_s20 + $0xe0] sm:$0xff] }
  0x20   : > { %2136 = vmatprep.subr.bf16.mxu1 %v2135_v54  ;;  %v320_v13 = vld [vmem:[%s2353_s20 + $0x50] sm:$0xff]  ;;  %v321_v14 = vld [vmem:[%s2353_s20 + $0x58] sm:$0xff]  ;;  %v2143_v16 = vpack.c.bf16 %v369_v9, %v368_v8  ;;  %v339_v19 = vld [vmem:[%s2353_s20 + $0xe8] sm:$0xff] }
  0x21   : > { %2106 = vmatpush3.bf16.msra.mxu0 %v2105_v60  ;;  %v352_v15 = vld [vmem:[%s2353_s20 + $0x150] sm:$0xff]  ;;  %v353_v17 = vld [vmem:[%s2353_s20 + $0x158] sm:$0xff]  ;;  %v370_v20 = vld [vmem:[%s2353_s20 + $0x1e0] sm:$0xff]  ;;  %v2113_v22 = vpack.c.bf16 %v321_v14, %v320_v13  ;;  %v2115_v26 = vpack.c.bf16 %v339_v19, %v338_v18 }
  0x22   : > { %2108 = vmatprep.subr.bf16.mxu0 %v2107_v0  ;;  %v371_v21 = vld [vmem:[%s2353_s20 + $0x1e8] sm:$0xff]  ;;  %v322_v23 = vld [vmem:[%s2353_s20 + $0x60] sm:$0xff]  ;;  %v2145_v25 = vpack.c.bf16 %v353_v17, %v352_v15  ;;  %v340_v29 = vld [vmem:[%s2353_s20 + $0xf0] sm:$0xff] }
  0x23   : > { %2138 = vmatpush3.bf16.msra.mxu1 %v2137_v63  ;;  %v323_v24 = vld [vmem:[%s2353_s20 + $0x68] sm:$0xff]  ;;  %v354_v27 = vld [vmem:[%s2353_s20 + $0x160] sm:$0xff]  ;;  %v2147_v30 = vpack.c.bf16 %v371_v21, %v370_v20  ;;  %v341_v31 = vld [vmem:[%s2353_s20 + $0xf8] sm:$0xff] }
  0x24   : > { %2140 = vmatprep.subr.bf16.mxu1 %v2139_v4  ;;  %v355_v28 = vld [vmem:[%s2353_s20 + $0x168] sm:$0xff]  ;;  %v448_v33 = vld [vmem:[%s3098_s2 + $0x50] sm:$0xff]  ;;  %v373_v35 = vld [vmem:[%s2353_s20 + $0x1f8] sm:$0xff]  ;;  %v2117_v36 = vpack.c.bf16 %v323_v24, %v322_v23  ;;  %v2119_v40 = vpack.c.bf16 %v341_v31, %v340_v29 }
  0x25   : > { %2110 = vmatpush3.bf16.msra.mxu0 %v2109_v10  ;;  %v447_v32 = vld [vmem:[%s3098_s2 + $0x48] sm:$0xff]  ;;  %v372_v34 = vld [vmem:[%s2353_s20 + $0x1f0] sm:$0xff]  ;;  %506 = vperm.xlu0 %2244, %v448_v33   ;;  %v449_v37 = vld [vmem:[%s3098_s2 + $0x58] sm:$0xff]  ;;  %v2149_v39 = vpack.c.bf16 %v355_v28, %v354_v27 }
  0x26   : > { %2112 = vmatprep.subr.bf16.mxu0 %v2111_v12  ;;  %501 = vperm.xlu1 %2245, %v447_v32   ;;  %v450_v38 = vld [vmem:[%s3098_s2 + $0x60] sm:$0xff]  ;;  %v324_v41 = vld [vmem:[%s2353_s20 + $0x70] sm:$0xff]  ;;  %v325_v42 = vld [vmem:[%s2353_s20 + $0x78] sm:$0xff]  ;;  %v2151_v43 = vpack.c.bf16 %v373_v35, %v372_v34 }
  0x27   : > { %2142 = vmatpush3.bf16.msra.mxu1 %v2141_v11  ;;  %v356_v44 = vld [vmem:[%s2353_s20 + $0x170] sm:$0xff]  ;;  %v357_v45 = vld [vmem:[%s2353_s20 + $0x178] sm:$0xff]  ;;  %v2121_v46 = vpack.c.bf16 %v325_v42, %v324_v41  ;;  %v451_v47 = vld [vmem:[%s3098_s2 + $0x68] sm:$0xff] }
  0x28   : > { %2144 = vmatprep.subr.bf16.mxu1 %v2143_v16  ;;  %v452_v48 = vld [vmem:[%s3098_s2 + $0x70] sm:$0xff]  ;;  %v2153_v49 = vpack.c.bf16 %v357_v45, %v356_v44  ;;  %v374_v50 = vld [vmem:[%s3097_s1] sm:$0xff]  ;;  %v453_v51 = vld [vmem:[%s3098_s2 + $0x78] sm:$0xff] }
  0x29   : > { %2114 = vmatpush3.bf16.msra.mxu0 %v2113_v22  ;;  %516 = vperm.xlu0 %2244, %v450_v38   ;;  %v376_v52 = vld [vmem:[%s3097_s1 + $0x10] sm:$0xff]  ;;  %v379_v53 = vld [vmem:[%s3097_s1 + $0x28] sm:$0xff]  ;;  %v381_v54 = vld [vmem:[%s3097_s1 + $0x38] sm:$0xff] }
  0x2a   : > { %2116 = vmatprep.subr.bf16.mxu0 %v2115_v26  ;;  %511 = vperm.xlu1 %2245, %v449_v37   ;;  %v888_v55 = vld [vmem:[%s3100_s4 + $0x80] sm:$0xff]  ;;  %v889_v57 = vld [vmem:[%s3100_s4 + $0x88] sm:$0xff]  ;;  %v380_v58 = vld [vmem:[%s3097_s1 + $0x30] sm:$0xff] }
  0x2b   : > { %2146 = vmatpush3.bf16.msra.mxu1 %v2145_v25  ;;  %v378_v56 = vld [vmem:[%s3097_s1 + $0x20] sm:$0xff]  ;;  %v383_v59 = vld [vmem:[%s3097_s1 + $0x48] sm:$0xff]  ;;  %v385_v60 = vld [vmem:[%s3097_s1 + $0x58] sm:$0xff] }
  0x2c   : > { %2148 = vmatprep.subr.bf16.mxu1 %v2147_v30  ;;  %v872_v61 = vld [vmem:[%s3100_s4] sm:$0xff]  ;;  %v873_v63 = vld [vmem:[%s3100_s4 + $0x8] sm:$0xff]  ;;  %v384_v0 = vld [vmem:[%s3097_s1 + $0x50] sm:$0xff] }
  0x2d   : > { %2118 = vmatpush3.bf16.msra.mxu0 %v2117_v36  ;;  %526 = vperm.xlu0 %2244, %v452_v48   ;;  %v382_v62 = vld [vmem:[%s3097_s1 + $0x40] sm:$0xff]  ;;  %v387_v1 = vld [vmem:[%s3097_s1 + $0x68] sm:$0xff]  ;;  %v389_v2 = vld [vmem:[%s3097_s1 + $0x78] sm:$0xff] }
  0x2e   : > { %2120 = vmatprep.subr.bf16.mxu0 %v2119_v40  ;;  %521 = vperm.xlu1 %2245, %v451_v47   ;;  %v890_v3 = vld [vmem:[%s3100_s4 + $0x90] sm:$0xff]  ;;  %v386_v4 = vld [vmem:[%s3097_s1 + $0x60] sm:$0xff]  ;;  %v891_v5 = vld [vmem:[%s3100_s4 + $0x98] sm:$0xff] }
  0x2f   : > { %2150 = vmatpush3.bf16.msra.mxu1 %v2149_v39  ;;  %v388_v6 = vld [vmem:[%s3097_s1 + $0x70] sm:$0xff]  ;;  %v391_v7 = vld [vmem:[%s3097_s1 + $0x88] sm:$0xff]  ;;  %v393_v8 = vld [vmem:[%s3097_s1 + $0x98] sm:$0xff] }
  0x30   : > { %2152 = vmatprep.subr.bf16.mxu1 %v2151_v43  ;;  %v874_v9 = vld [vmem:[%s3100_s4 + $0x10] sm:$0xff]  ;;  %v390_v10 = vld [vmem:[%s3097_s1 + $0x80] sm:$0xff]  ;;  %v875_v11 = vld [vmem:[%s3100_s4 + $0x18] sm:$0xff] }
  0x31   : > { %2122 = vmatpush3.bf16.msra.mxu0 %v2121_v46  ;;  %986 = vperm.xlu0 %2244, %v888_v55   ;;  %v392_v12 = vld [vmem:[%s3097_s1 + $0x90] sm:$0xff]  ;;  %v395_v13 = vld [vmem:[%s3097_s1 + $0xa8] sm:$0xff]  ;;  %v397_v14 = vld [vmem:[%s3097_s1 + $0xb8] sm:$0xff] }
  0x32   : > { %531 = vperm.xlu1 %2245, %v453_v51   ;;  %v892_v15 = vld [vmem:[%s3100_s4 + $0xa0] sm:$0xff]  ;;  %v893_v17 = vld [vmem:[%s3100_s4 + $0xa8] sm:$0xff]  ;;  %v396_v18 = vld [vmem:[%s3097_s1 + $0xb0] sm:$0xff] }
  0x33   : > { %2154 = vmatpush3.bf16.msra.mxu1 %v2153_v49  ;;  %v394_v16 = vld [vmem:[%s3097_s1 + $0xa0] sm:$0xff]  ;;  %v399_v19 = vld [vmem:[%s3097_s1 + $0xc8] sm:$0xff]  ;;  %v401_v20 = vld [vmem:[%s3097_s1 + $0xd8] sm:$0xff] }
  0x34   : > { %599 = vmatmul.mubr.f32.vlgmr.msra.gmra.mrb[0].mxu0 %v374_v50  ;;  %v876_v21 = vld [vmem:[%s3100_s4 + $0x20] sm:$0xff]  ;;  %v877_v23 = vld [vmem:[%s3100_s4 + $0x28] sm:$0xff]  ;;  %v400_v24 = vld [vmem:[%s3097_s1 + $0xd0] sm:$0xff] }
  0x35   : > { %603 = vmatprep.mubr.f32.mxu0 %v379_v53  ;;  %906 = vperm.xlu0 %2244, %v872_v61   ;;  %v398_v22 = vld [vmem:[%s3097_s1 + $0xc0] sm:$0xff]  ;;  %v403_v25 = vld [vmem:[%s3097_s1 + $0xe8] sm:$0xff]  ;;  %v405_v26 = vld [vmem:[%s3097_s1 + $0xf8] sm:$0xff] }
  0x36   : > { %744 = vmatmul.mubr.f32.vlgmr.msra.gmra.mrb[0].mxu1 %v376_v52  ;;  %991 = vperm.xlu1 %2245, %v889_v57   ;;  %v894_v27 = vld [vmem:[%s3100_s4 + $0xb0] sm:$0xff]  ;;  %v402_v28 = vld [vmem:[%s3097_s1 + $0xe0] sm:$0xff]  ;;  %v895_v29 = vld [vmem:[%s3100_s4 + $0xb8] sm:$0xff] }
  0x37   : > { %748 = vmatprep.mubr.f32.mxu1 %v381_v54  ;;  %v404_v30 = vld [vmem:[%s3097_s1 + $0xf0] sm:$0xff]  ;;  %v407_v31 = vld [vmem:[%s3097_s1 + $0x108] sm:$0xff]  ;;  %v409_v32 = vld [vmem:[%s3097_s1 + $0x118] sm:$0xff] }
  0x38   : > { %604 = vmatmul.mubr.f32.gmra.mrb[2].mxu0 %v378_v56  ;;  %v878_v33 = vld [vmem:[%s3100_s4 + $0x30] sm:$0xff]  ;;  %v406_v34 = vld [vmem:[%s3097_s1 + $0x100] sm:$0xff]  ;;  %v879_v35 = vld [vmem:[%s3100_s4 + $0x38] sm:$0xff] }
  0x39   : > { %608 = vmatprep.mubr.f32.mxu0 %v383_v59  ;;  %996 = vperm.xlu0 %2244, %v890_v3   ;;  %v408_v36 = vld [vmem:[%s3097_s1 + $0x110] sm:$0xff]  ;;  %v411_v37 = vld [vmem:[%s3097_s1 + $0x128] sm:$0xff]  ;;  %v413_v38 = vld [vmem:[%s3097_s1 + $0x138] sm:$0xff] }
  0x3a   : > { %749 = vmatmul.mubr.f32.gmra.mrb[2].mxu1 %v380_v58  ;;  %911 = vperm.xlu1 %2245, %v873_v63   ;;  %v896_v39 = vld [vmem:[%s3100_s4 + $0xc0] sm:$0xff]  ;;  %v897_v41 = vld [vmem:[%s3100_s4 + $0xc8] sm:$0xff]  ;;  %v412_v42 = vld [vmem:[%s3097_s1 + $0x130] sm:$0xff] }
  0x3b   : > { %753 = vmatprep.mubr.f32.mxu1 %v385_v60  ;;  %v410_v40 = vld [vmem:[%s3097_s1 + $0x120] sm:$0xff]  ;;  %v415_v43 = vld [vmem:[%s3097_s1 + $0x148] sm:$0xff]  ;;  %v417_v44 = vld [vmem:[%s3097_s1 + $0x158] sm:$0xff] }
  0x3c   : > { %609 = vmatmul.mubr.f32.gmra.mrb[4].mxu0 %v382_v62  ;;  %v880_v45 = vld [vmem:[%s3100_s4 + $0x40] sm:$0xff]  ;;  %v881_v47 = vld [vmem:[%s3100_s4 + $0x48] sm:$0xff]  ;;  %v416_v48 = vld [vmem:[%s3097_s1 + $0x150] sm:$0xff] }
  0x3d   : > { %613 = vmatprep.mubr.f32.mxu0 %v387_v1  ;;  %916 = vperm.xlu0 %2244, %v874_v9   ;;  %v414_v46 = vld [vmem:[%s3097_s1 + $0x140] sm:$0xff]  ;;  %v419_v49 = vld [vmem:[%s3097_s1 + $0x168] sm:$0xff]  ;;  %v421_v50 = vld [vmem:[%s3097_s1 + $0x178] sm:$0xff] }
  0x3e   : > { %754 = vmatmul.mubr.f32.gmra.mrb[4].mxu1 %v384_v0  ;;  %1001 = vperm.xlu1 %2245, %v891_v5   ;;  %v898_v51 = vld [vmem:[%s3100_s4 + $0xd0] sm:$0xff]  ;;  %v418_v52 = vld [vmem:[%s3097_s1 + $0x160] sm:$0xff]  ;;  %v899_v53 = vld [vmem:[%s3100_s4 + $0xd8] sm:$0xff] }
  0x3f   : > { %758 = vmatprep.mubr.f32.mxu1 %v389_v2  ;;  %v420_v54 = vld [vmem:[%s3097_s1 + $0x170] sm:$0xff]  ;;  %v423_v55 = vld [vmem:[%s3097_s1 + $0x188] sm:$0xff]  ;;  %v425_v56 = vld [vmem:[%s3097_s1 + $0x198] sm:$0xff] }
  0x40   : > { %614 = vmatmul.mubr.f32.gmra.mrb[6].mxu0 %v386_v4  ;;  %v882_v57 = vld [vmem:[%s3100_s4 + $0x50] sm:$0xff]  ;;  %v422_v58 = vld [vmem:[%s3097_s1 + $0x180] sm:$0xff]  ;;  %v883_v59 = vld [vmem:[%s3100_s4 + $0x58] sm:$0xff] }
  0x41   : > { %618 = vmatprep.mubr.f32.mxu0 %v391_v7  ;;  %1006 = vperm.xlu0 %2244, %v892_v15   ;;  %v424_v60 = vld [vmem:[%s3097_s1 + $0x190] sm:$0xff]  ;;  %v427_v61 = vld [vmem:[%s3097_s1 + $0x1a8] sm:$0xff]  ;;  %v429_v62 = vld [vmem:[%s3097_s1 + $0x1b8] sm:$0xff] }
  0x42   : > { %759 = vmatmul.mubr.f32.gmra.mrb[6].mxu1 %v388_v6  ;;  %921 = vperm.xlu1 %2245, %v875_v11   ;;  %v900_v63 = vld [vmem:[%s3100_s4 + $0xe0] sm:$0xff]  ;;  %v901_v1 = vld [vmem:[%s3100_s4 + $0xe8] sm:$0xff]  ;;  %v428_v2 = vld [vmem:[%s3097_s1 + $0x1b0] sm:$0xff] }
  0x43   : > { %763 = vmatprep.mubr.f32.mxu1 %v393_v8  ;;  %v426_v0 = vld [vmem:[%s3097_s1 + $0x1a0] sm:$0xff]  ;;  %v431_v3 = vld [vmem:[%s3097_s1 + $0x1c8] sm:$0xff]  ;;  %v433_v4 = vld [vmem:[%s3097_s1 + $0x1d8] sm:$0xff] }
  0x44   : > { %619 = vmatmul.mubr.f32.gmra.mrb[8].mxu0 %v390_v10  ;;  %v884_v5 = vld [vmem:[%s3100_s4 + $0x60] sm:$0xff]  ;;  %v885_v7 = vld [vmem:[%s3100_s4 + $0x68] sm:$0xff]  ;;  %v432_v8 = vld [vmem:[%s3097_s1 + $0x1d0] sm:$0xff] }
  0x45   : > { %623 = vmatprep.mubr.f32.mxu0 %v395_v13  ;;  %926 = vperm.xlu0 %2244, %v876_v21   ;;  %v430_v6 = vld [vmem:[%s3097_s1 + $0x1c0] sm:$0xff]  ;;  %v435_v9 = vld [vmem:[%s3097_s1 + $0x1e8] sm:$0xff]  ;;  %v437_v10 = vld [vmem:[%s3097_s1 + $0x1f8] sm:$0xff] }
  0x46   : > { %764 = vmatmul.mubr.f32.gmra.mrb[8].mxu1 %v392_v12  ;;  %1011 = vperm.xlu1 %2245, %v893_v17   ;;  %v902_v11 = vld [vmem:[%s3100_s4 + $0xf0] sm:$0xff]  ;;  %v434_v12 = vld [vmem:[%s3097_s1 + $0x1e0] sm:$0xff]  ;;  %v903_v13 = vld [vmem:[%s3100_s4 + $0xf8] sm:$0xff] }
  0x47   : > { %768 = vmatprep.mubr.f32.mxu1 %v397_v14  ;;  %v436_v14 = vld [vmem:[%s3097_s1 + $0x1f0] sm:$0xff]  ;;  %v1353_v17 = vld [vmem:[%s3102_s6] sm:$0xff] }
  0x48   : > { %624 = vmatmul.mubr.f32.gmra.mrb[10].mxu0 %v394_v16  ;;  %v886_v15 = vld [vmem:[%s3100_s4 + $0x70] sm:$0xff]  ;;  %v887_v16 = vld [vmem:[%s3100_s4 + $0x78] sm:$0xff]  ;;  %v1357_v21 = vld [vmem:[%s3102_s6 + $0x20] sm:$0xff] }
  0x49   : > { %628 = vmatprep.mubr.f32.mxu0 %v399_v19  ;;  %1016 = vperm.xlu0 %2244, %v894_v27   ;;  %v1355_v19 = vld [vmem:[%s3102_s6 + $0x10] sm:$0xff] }
  0x4a   : > { %769 = vmatmul.mubr.f32.gmra.mrb[10].mxu1 %v396_v18  ;;  %931 = vperm.xlu1 %2245, %v877_v23   ;;  %v1354_v18 = vld [vmem:[%s3102_s6 + $0x8] sm:$0xff]  ;;  %v1359_v23 = vld [vmem:[%s3102_s6 + $0x30] sm:$0xff] }
  0x4b   : > { %773 = vmatprep.mubr.f32.mxu1 %v401_v20  ;;  %v1356_v20 = vld [vmem:[%s3102_s6 + $0x18] sm:$0xff]  ;;  %v1363_v27 = vld [vmem:[%s3102_s6 + $0x50] sm:$0xff] }
  0x4c   : > { %629 = vmatmul.mubr.f32.gmra.mrb[12].mxu0 %v398_v22  ;;  %v1358_v22 = vld [vmem:[%s3102_s6 + $0x28] sm:$0xff] }
  0x4d   : > { %633 = vmatprep.mubr.f32.mxu0 %v403_v25  ;;  %936 = vperm.xlu0 %2244, %v878_v33   ;;  %v1361_v25 = vld [vmem:[%s3102_s6 + $0x40] sm:$0xff] }
  0x4e   : > { %774 = vmatmul.mubr.f32.gmra.mrb[12].mxu1 %v400_v24  ;;  %1021 = vperm.xlu1 %2245, %v895_v29   ;;  %v1360_v24 = vld [vmem:[%s3102_s6 + $0x38] sm:$0xff]  ;;  %v1365_v29 = vld [vmem:[%s3102_s6 + $0x60] sm:$0xff] }
  0x4f   : > { %778 = vmatprep.mubr.f32.mxu1 %v405_v26  ;;  %v1362_v26 = vld [vmem:[%s3102_s6 + $0x48] sm:$0xff]  ;;  %v840_v33 = vld [vmem:[%s3099_s3] sm:$0xff] }
  0x50   : > { %634 = vmatmul.mubr.f32.gmra.mrb[14].mxu0 %v402_v28  ;;  %v1364_v28 = vld [vmem:[%s3102_s6 + $0x58] sm:$0xff] }
  0x51   : > { %638 = vmatprep.mubr.f32.mxu0 %v407_v31  ;;  %1026 = vperm.xlu0 %2244, %v896_v39   ;;  %v1367_v31 = vld [vmem:[%s3102_s6 + $0x70] sm:$0xff] }
  0x52   : > { %779 = vmatmul.mubr.f32.gmra.mrb[14].mxu1 %v404_v30  ;;  %941 = vperm.xlu1 %2245, %v879_v35   ;;  %v1366_v30 = vld [vmem:[%s3102_s6 + $0x68] sm:$0xff] }
  0x53   : > { %783 = vmatprep.mubr.f32.mxu1 %v409_v32  ;;  %v1368_v32 = vld [vmem:[%s3102_s6 + $0x78] sm:$0xff] }
  0x54   : > { %639 = vmatmul.mubr.f32.gmra.mrb[16].mxu0 %v406_v34 }
  0x55   : > { %643 = vmatprep.mubr.f32.mxu0 %v411_v37  ;;  %946 = vperm.xlu0 %2244, %v880_v45  }
  0x56   : > { %784 = vmatmul.mubr.f32.gmra.mrb[16].mxu1 %v408_v36  ;;  %1031 = vperm.xlu1 %2245, %v897_v41  }
  0x57   : > { %788 = vmatprep.mubr.f32.mxu1 %v413_v38 }
  0x58   : > { %644 = vmatmul.mubr.f32.gmra.mrb[18].mxu0 %v410_v40 }
  0x59   : > { %648 = vmatprep.mubr.f32.mxu0 %v415_v43  ;;  %1036 = vperm.xlu0 %2244, %v898_v51  }
  0x5a   : > { %789 = vmatmul.mubr.f32.gmra.mrb[18].mxu1 %v412_v42  ;;  %951 = vperm.xlu1 %2245, %v881_v47  }
  0x5b   : > { %793 = vmatprep.mubr.f32.mxu1 %v417_v44 }
  0x5c   : > { %649 = vmatmul.mubr.f32.gmra.mrb[20].mxu0 %v414_v46 }
  0x5d   : > { %653 = vmatprep.mubr.f32.mxu0 %v419_v49  ;;  %956 = vperm.xlu0 %2244, %v882_v57  }
  0x5e   : > { %794 = vmatmul.mubr.f32.gmra.mrb[20].mxu1 %v416_v48  ;;  %1041 = vperm.xlu1 %2245, %v899_v53  }
  0x5f   : > { %798 = vmatprep.mubr.f32.mxu1 %v421_v50 }
  0x60   : > { %654 = vmatmul.mubr.f32.gmra.mrb[22].mxu0 %v418_v52 }
  0x61   : > { %658 = vmatprep.mubr.f32.mxu0 %v423_v55  ;;  %1046 = vperm.xlu0 %2244, %v900_v63  }
  0x62   : > { %799 = vmatmul.mubr.f32.gmra.mrb[22].mxu1 %v420_v54  ;;  %961 = vperm.xlu1 %2245, %v883_v59  }
  0x63   : > { %803 = vmatprep.mubr.f32.mxu1 %v425_v56 }
  0x64   : > { %659 = vmatmul.mubr.f32.gmra.mrb[24].mxu0 %v422_v58 }
  0x65   : > { %663 = vmatprep.mubr.f32.mxu0 %v427_v61  ;;  %966 = vperm.xlu0 %2244, %v884_v5  }
  0x66   : > { %804 = vmatmul.mubr.f32.gmra.mrb[24].mxu1 %v424_v60  ;;  %1051 = vperm.xlu1 %2245, %v901_v1  }
  0x67   : > { %808 = vmatprep.mubr.f32.mxu1 %v429_v62 }
  0x68   : > { %664 = vmatmul.mubr.f32.gmra.mrb[26].mxu0 %v426_v0 }
  0x69   : > { %668 = vmatprep.mubr.f32.mxu0 %v431_v3  ;;  %1056 = vperm.xlu0 %2244, %v902_v11  }
  0x6a   : > { %809 = vmatmul.mubr.f32.gmra.mrb[26].mxu1 %v428_v2  ;;  %971 = vperm.xlu1 %2245, %v885_v7  }
  0x6b   : > { %813 = vmatprep.mubr.f32.mxu1 %v433_v4 }
  0x6c   : > { %669 = vmatmul.mubr.f32.gmra.mrb[28].mxu0 %v430_v6 }
  0x6d   : > { %673 = vmatprep.mubr.f32.mxu0 %v435_v9  ;;  %976 = vperm.xlu0 %2244, %v886_v15  }
  0x6e   : > { %814 = vmatmul.mubr.f32.gmra.mrb[28].mxu1 %v432_v8  ;;  %1061 = vperm.xlu1 %2245, %v903_v13  }
  0x6f   : > { %818 = vmatprep.mubr.f32.mxu1 %v437_v10 }
  0x70   : > { %674 = vmatmul.mubr.f32.gmra.mrb[30].mxu0 %v434_v12 }
  0x71   : > { %1371 = vperm.xlu0 %2244, %v1353_v17   ;;  %2043 = vmatprep.mubr.f32.mxu0 %v840_v33 }
  0x72   : > { %819 = vmatmul.mubr.f32.gmra.mrb[30].mxu1 %v436_v14  ;;  %981 = vperm.xlu1 %2245, %v887_v16  }
  0x75   : > { %1381 = vperm.xlu0 %2244, %v1355_v19  }
  0x76   : > { %1376 = vperm.xlu1 %2245, %v1354_v18  }
  0x79   : > { %1391 = vperm.xlu0 %2244, %v1357_v21  }
  0x7a   : > { %1386 = vperm.xlu1 %2245, %v1356_v20  }
  0x7d   : > { %1401 = vperm.xlu0 %2244, %v1359_v23  }
  0x7e   : > { %1396 = vperm.xlu1 %2245, %v1358_v22  }
  0x81   : > { %1411 = vperm.xlu0 %2244, %v1361_v25  }
  0x82   : > { %1406 = vperm.xlu1 %2245, %v1360_v24  }
  0x85   : > { %1421 = vperm.xlu0 %2244, %v1363_v27  }
  0x86   : > { %1416 = vperm.xlu1 %2245, %v1362_v26  }
  0x87   : > { %v457_v34 = vpop.permute.xlu0 %456  ;;  %v467_v50 = vpop.permute.xlu1 %466 }
  0x89   : > { %1431 = vperm.xlu0 %2244, %v1365_v29  }
  0x8a   : > { %1426 = vperm.xlu1 %2245, %v1364_v28  }
  0x8b   : > { %v462_v48 = vpop.permute.xlu0 %461  ;;  %v472_v5 = vpop.permute.xlu1 %471 }
  0x8d   : > { %1441 = vperm.xlu0 %2244, %v1367_v31  }
  0x8e   : > { %1436 = vperm.xlu1 %2245, %v1366_v30  }
  0x8f   : > { %v477_v14 = vpop.permute.xlu0 %476  ;;  %v482_v26 = vpop.permute.xlu1 %481 }
  0x92   : > { %1446 = vperm.xlu1 %2245, %v1368_v32  }
 0x107   : > { %v1755_v35 = vpop.f32.mrb[0].mxu0 }
 0x108   : > { %v1756_v36 = vpop.f32.mrb[1].mxu0 }
 0x109   : > { %v1835_v37 = vpop.f32.mrb[0].mxu1  ;;  %v1757_v38 = vadd.f32 %v1756_v36, %v1755_v35  ;;  %v487_v35 = vpop.permute.xlu0 %486 }
 0x10a   : > { %v1836_v39 = vpop.f32.mrb[1].mxu1 }
 0x10b   : > { %v1837_v40 = vadd.f32 %v1836_v39, %v1835_v37  ;;  %v601_v41 = vadd.f32 %v1757_v38, %v457_v34  ;;  %v1758_v42 = vpop.f32.mrb[2].mxu0 }
 0x10c   : > { %v1759_v43 = vpop.f32.mrb[3].mxu0 }
 0x10d   : > { %v1838_v44 = vpop.f32.mrb[2].mxu1  ;;  %v746_v45 = vadd.f32 %v1837_v40, %v601_v41  ;;  %v1760_v46 = vadd.f32 %v1759_v43, %v1758_v42 }
 0x10e   : > { %v1839_v47 = vpop.f32.mrb[3].mxu1 }
 0x10f   : > { %v1840_v49 = vadd.f32 %v1839_v47, %v1838_v44  ;;  %v606_v51 = vadd.f32 %v1760_v46, %v462_v48  ;;  %v1761_v52 = vpop.f32.mrb[4].mxu0  ;;  %v824_v59 = vmax.f32 %v746_v45, 0.0  ;;  %v492_v47 = vpop.permute.xlu1 %491 }
 0x110   : > { %v1762_v53 = vpop.f32.mrb[5].mxu0 }
 0x111   : > { %v1841_v54 = vpop.f32.mrb[4].mxu1  ;;  %v751_v55 = vadd.f32 %v1840_v49, %v606_v51  ;;  %v1763_v56 = vadd.f32 %v1762_v53, %v1761_v52 }
 0x112   : > { %v1842_v57 = vpop.f32.mrb[5].mxu1 }
 0x113   : > { %v1843_v58 = vadd.f32 %v1842_v57, %v1841_v54  ;;  %v825_v60 = vmax.f32 %v751_v55, 0.0  ;;  %v611_v61 = vadd.f32 %v1763_v56, %v467_v50  ;;  %v1764_v62 = vpop.f32.mrb[6].mxu0  ;;  %v497_v56 = vpop.permute.xlu0 %496 }
 0x114   : > { %v1765_v63 = vpop.f32.mrb[7].mxu0 }
 0x115   : > { %v1844_v0 = vpop.f32.mrb[6].mxu1  ;;  %v756_v1 = vadd.f32 %v1843_v58, %v611_v61  ;;  %v1766_v2 = vadd.f32 %v1765_v63, %v1764_v62  ;;  %v2155_v4 = vpack.c.bf16 %v825_v60, %v824_v59 }
 0x116   : > { %v1845_v3 = vpop.f32.mrb[7].mxu1 }
 0x117   : > { %v1846_v6 = vadd.f32 %v1845_v3, %v1844_v0  ;;  %v616_v7 = vadd.f32 %v1766_v2, %v472_v5  ;;  %v1767_v8 = vpop.f32.mrb[8].mxu0  ;;  %2156 = vmatprep.subr.bf16.mxu0 %v2155_v4  ;;  %v826_v16 = vmax.f32 %v756_v1, 0.0 }
 0x118   : > { %v1768_v9 = vpop.f32.mrb[9].mxu0  ;;  %2158 = vmatpush3.bf16.msra.mxu0 %v2155_v4  ;;  %v502_v4 = vpop.permute.xlu1 %501 }
 0x119   : > { %v1847_v10 = vpop.f32.mrb[8].mxu1  ;;  %v761_v11 = vadd.f32 %v1846_v6, %v616_v7  ;;  %v1769_v12 = vadd.f32 %v1768_v9, %v1767_v8 }
 0x11a   : > { %v1848_v13 = vpop.f32.mrb[9].mxu1 }
 0x11b   : > { %v1849_v15 = vadd.f32 %v1848_v13, %v1847_v10  ;;  %v827_v17 = vmax.f32 %v761_v11, 0.0  ;;  %v621_v18 = vadd.f32 %v1769_v12, %v477_v14  ;;  %v1770_v19 = vpop.f32.mrb[10].mxu0  ;;  %v507_v13 = vpop.permute.xlu0 %506 }
 0x11c   : > { %v1771_v20 = vpop.f32.mrb[11].mxu0 }
 0x11d   : > { %v1850_v21 = vpop.f32.mrb[10].mxu1  ;;  %v766_v22 = vadd.f32 %v1849_v15, %v621_v18  ;;  %v1772_v23 = vadd.f32 %v1771_v20, %v1770_v19  ;;  %v2159_v25 = vpack.c.bf16 %v827_v17, %v826_v16 }
 0x11e   : > { %v1851_v24 = vpop.f32.mrb[11].mxu1 }
 0x11f   : > { %v1852_v27 = vadd.f32 %v1851_v24, %v1850_v21  ;;  %v626_v28 = vadd.f32 %v1772_v23, %v482_v26  ;;  %v1773_v29 = vpop.f32.mrb[12].mxu0  ;;  %2160 = vmatprep.subr.bf16.mxu0 %v2159_v25  ;;  %v828_v37 = vmax.f32 %v766_v22, 0.0 }
 0x120   : > { %v1774_v30 = vpop.f32.mrb[13].mxu0  ;;  %2162 = vmatpush3.bf16.msra.mxu0 %v2159_v25  ;;  %v512_v25 = vpop.permute.xlu1 %511 }
 0x121   : > { %v1853_v31 = vpop.f32.mrb[12].mxu1  ;;  %v771_v32 = vadd.f32 %v1852_v27, %v626_v28  ;;  %v1775_v33 = vadd.f32 %v1774_v30, %v1773_v29 }
 0x122   : > { %v1854_v34 = vpop.f32.mrb[13].mxu1 }
 0x123   : > { %v1855_v36 = vadd.f32 %v1854_v34, %v1853_v31  ;;  %v829_v38 = vmax.f32 %v771_v32, 0.0  ;;  %v631_v39 = vadd.f32 %v1775_v33, %v487_v35  ;;  %v1776_v40 = vpop.f32.mrb[14].mxu0  ;;  %v517_v34 = vpop.permute.xlu0 %516 }
 0x124   : > { %v1777_v41 = vpop.f32.mrb[15].mxu0 }
 0x125   : > { %v1856_v42 = vpop.f32.mrb[14].mxu1  ;;  %v776_v43 = vadd.f32 %v1855_v36, %v631_v39  ;;  %v1778_v44 = vadd.f32 %v1777_v41, %v1776_v40  ;;  %v2163_v46 = vpack.c.bf16 %v829_v38, %v828_v37 }
 0x126   : > { %v1857_v45 = vpop.f32.mrb[15].mxu1 }
 0x127   : > { %v1858_v48 = vadd.f32 %v1857_v45, %v1856_v42  ;;  %v636_v49 = vadd.f32 %v1778_v44, %v492_v47  ;;  %v1779_v50 = vpop.f32.mrb[16].mxu0  ;;  %2164 = vmatprep.subr.bf16.mxu0 %v2163_v46  ;;  %v830_v58 = vmax.f32 %v776_v43, 0.0 }
 0x128   : > { %v1780_v51 = vpop.f32.mrb[17].mxu0  ;;  %2166 = vmatpush3.bf16.msra.mxu0 %v2163_v46  ;;  %v522_v46 = vpop.permute.xlu1 %521 }
 0x129   : > { %v1859_v52 = vpop.f32.mrb[16].mxu1  ;;  %v781_v53 = vadd.f32 %v1858_v48, %v636_v49  ;;  %v1781_v54 = vadd.f32 %v1780_v51, %v1779_v50 }
 0x12a   : > { %v1860_v55 = vpop.f32.mrb[17].mxu1 }
 0x12b   : > { %v1861_v57 = vadd.f32 %v1860_v55, %v1859_v52  ;;  %v831_v59 = vmax.f32 %v781_v53, 0.0  ;;  %v641_v60 = vadd.f32 %v1781_v54, %v497_v56  ;;  %v1782_v61 = vpop.f32.mrb[18].mxu0  ;;  %v527_v55 = vpop.permute.xlu0 %526 }
 0x12c   : > { %v1783_v62 = vpop.f32.mrb[19].mxu0 }
 0x12d   : > { %v1862_v63 = vpop.f32.mrb[18].mxu1  ;;  %v786_v0 = vadd.f32 %v1861_v57, %v641_v60  ;;  %v1784_v1 = vadd.f32 %v1783_v62, %v1782_v61  ;;  %v2167_v3 = vpack.c.bf16 %v831_v59, %v830_v58 }
 0x12e   : > { %v1863_v2 = vpop.f32.mrb[19].mxu1 }
 0x12f   : > { %v1864_v5 = vadd.f32 %v1863_v2, %v1862_v63  ;;  %v646_v6 = vadd.f32 %v1784_v1, %v502_v4  ;;  %v1785_v7 = vpop.f32.mrb[20].mxu0  ;;  %2168 = vmatprep.subr.bf16.mxu0 %v2167_v3  ;;  %v832_v15 = vmax.f32 %v786_v0, 0.0 }
 0x130   : > { %v1786_v8 = vpop.f32.mrb[21].mxu0  ;;  %2170 = vmatpush3.bf16.msra.mxu0 %v2167_v3  ;;  %v532_v3 = vpop.permute.xlu1 %531 }
 0x131   : > { %v1865_v9 = vpop.f32.mrb[20].mxu1  ;;  %v791_v10 = vadd.f32 %v1864_v5, %v646_v6  ;;  %v1787_v11 = vadd.f32 %v1786_v8, %v1785_v7 }
 0x132   : > { %v1866_v12 = vpop.f32.mrb[21].mxu1 }
 0x133   : > { %v1867_v14 = vadd.f32 %v1866_v12, %v1865_v9  ;;  %v833_v16 = vmax.f32 %v791_v10, 0.0  ;;  %v651_v17 = vadd.f32 %v1787_v11, %v507_v13  ;;  %v1788_v18 = vpop.f32.mrb[22].mxu0  ;;  %v841_v10 = vld [vmem:[%s3099_s3 + $0x8] sm:$0xff]  ;;  %v842_v11 = vld [vmem:[%s3099_s3 + $0x10] sm:$0xff]  ;;  %v843_v12 = vld [vmem:[%s3099_s3 + $0x18] sm:$0xff] }
 0x134   : > { %v1789_v19 = vpop.f32.mrb[23].mxu0  ;;  %v844_v13 = vld [vmem:[%s3099_s3 + $0x20] sm:$0xff] }
 0x135   : > { %v1868_v20 = vpop.f32.mrb[22].mxu1  ;;  %v796_v21 = vadd.f32 %v1867_v14, %v651_v17  ;;  %v1790_v22 = vadd.f32 %v1789_v19, %v1788_v18  ;;  %v2171_v24 = vpack.c.bf16 %v833_v16, %v832_v15  ;;  %v845_v14 = vld [vmem:[%s3099_s3 + $0x28] sm:$0xff]  ;;  %v846_v15 = vld [vmem:[%s3099_s3 + $0x30] sm:$0xff]  ;;  %v847_v16 = vld [vmem:[%s3099_s3 + $0x38] sm:$0xff] }
 0x136   : > { %v1869_v23 = vpop.f32.mrb[23].mxu1  ;;  %v848_v17 = vld [vmem:[%s3099_s3 + $0x40] sm:$0xff]  ;;  %v849_v18 = vld [vmem:[%s3099_s3 + $0x48] sm:$0xff]  ;;  %v850_v19 = vld [vmem:[%s3099_s3 + $0x50] sm:$0xff] }
 0x137   : > { %v1870_v26 = vadd.f32 %v1869_v23, %v1868_v20  ;;  %v656_v27 = vadd.f32 %v1790_v22, %v512_v25  ;;  %v1791_v28 = vpop.f32.mrb[24].mxu0  ;;  %2172 = vmatprep.subr.bf16.mxu0 %v2171_v24  ;;  %v834_v36 = vmax.f32 %v796_v21, 0.0  ;;  %v851_v20 = vld [vmem:[%s3099_s3 + $0x58] sm:$0xff]  ;;  %v852_v21 = vld [vmem:[%s3099_s3 + $0x60] sm:$0xff]  ;;  %v853_v22 = vld [vmem:[%s3099_s3 + $0x68] sm:$0xff] }
 0x138   : > { %v1792_v29 = vpop.f32.mrb[25].mxu0  ;;  %2174 = vmatpush3.bf16.msra.mxu0 %v2171_v24  ;;  %v854_v23 = vld [vmem:[%s3099_s3 + $0x70] sm:$0xff]  ;;  %v855_v24 = vld [vmem:[%s3099_s3 + $0x78] sm:$0xff]  ;;  %v856_v25 = vld [vmem:[%s3099_s3 + $0x80] sm:$0xff] }
 0x139   : > { %v1871_v30 = vpop.f32.mrb[24].mxu1  ;;  %v801_v31 = vadd.f32 %v1870_v26, %v656_v27  ;;  %v1793_v32 = vadd.f32 %v1792_v29, %v1791_v28  ;;  %v857_v26 = vld [vmem:[%s3099_s3 + $0x88] sm:$0xff]  ;;  %v858_v27 = vld [vmem:[%s3099_s3 + $0x90] sm:$0xff]  ;;  %v859_v28 = vld [vmem:[%s3099_s3 + $0x98] sm:$0xff] }
 0x13a   : > { %v1872_v33 = vpop.f32.mrb[25].mxu1  ;;  %v860_v29 = vld [vmem:[%s3099_s3 + $0xa0] sm:$0xff] }
 0x13b   : > { %v1873_v35 = vadd.f32 %v1872_v33, %v1871_v30  ;;  %v835_v37 = vmax.f32 %v801_v31, 0.0  ;;  %v661_v38 = vadd.f32 %v1793_v32, %v517_v34  ;;  %v1794_v39 = vpop.f32.mrb[26].mxu0  ;;  %v861_v30 = vld [vmem:[%s3099_s3 + $0xa8] sm:$0xff]  ;;  %v862_v31 = vld [vmem:[%s3099_s3 + $0xb0] sm:$0xff]  ;;  %v863_v32 = vld [vmem:[%s3099_s3 + $0xb8] sm:$0xff] }
 0x13c   : > { %v1795_v40 = vpop.f32.mrb[27].mxu0  ;;  %v864_v33 = vld [vmem:[%s3099_s3 + $0xc0] sm:$0xff]  ;;  %v865_v34 = vld [vmem:[%s3099_s3 + $0xc8] sm:$0xff] }
 0x13d   : > { %v1874_v41 = vpop.f32.mrb[26].mxu1  ;;  %v806_v42 = vadd.f32 %v1873_v35, %v661_v38  ;;  %v1796_v43 = vadd.f32 %v1795_v40, %v1794_v39  ;;  %v2175_v45 = vpack.c.bf16 %v835_v37, %v834_v36  ;;  %v866_v35 = vld [vmem:[%s3099_s3 + $0xd0] sm:$0xff]  ;;  %v867_v36 = vld [vmem:[%s3099_s3 + $0xd8] sm:$0xff]  ;;  %v868_v37 = vld [vmem:[%s3099_s3 + $0xe0] sm:$0xff] }
 0x13e   : > { %v1875_v44 = vpop.f32.mrb[27].mxu1  ;;  %v869_v38 = vld [vmem:[%s3099_s3 + $0xe8] sm:$0xff]  ;;  %v870_v39 = vld [vmem:[%s3099_s3 + $0xf0] sm:$0xff]  ;;  %v871_v40 = vld [vmem:[%s3099_s3 + $0xf8] sm:$0xff] }
 0x13f   : > { %v1876_v47 = vadd.f32 %v1875_v44, %v1874_v41  ;;  %v666_v48 = vadd.f32 %v1796_v43, %v522_v46  ;;  %v1797_v49 = vpop.f32.mrb[28].mxu0  ;;  %2176 = vmatprep.subr.bf16.mxu0 %v2175_v45  ;;  %v836_v57 = vmax.f32 %v806_v42, 0.0  ;;  %v2881_v41 = vpop.permute.xlu1 %991  ;;  %v1322_v43 = vld [vmem:[%s3101_s5 + $0x8] sm:$0xff] }
 0x140   : > { %v1798_v50 = vpop.f32.mrb[29].mxu0  ;;  %2178 = vmatpush3.bf16.msra.mxu0 %v2175_v45  ;;  %v2883_v42 = vpop.permute.xlu0 %986  ;;  %1513 = vmatprep.mubr.f32.mxu1 %v1322_v43 }
 0x141   : > { %v1877_v51 = vpop.f32.mrb[28].mxu1  ;;  %v811_v52 = vadd.f32 %v1876_v47, %v666_v48  ;;  %v1799_v53 = vadd.f32 %v1798_v50, %v1797_v49 }
 0x142   : > { %v1878_v54 = vpop.f32.mrb[29].mxu1 }
 0x143   : > { %v1879_v56 = vadd.f32 %v1878_v54, %v1877_v51  ;;  %v837_v58 = vmax.f32 %v811_v52, 0.0  ;;  %v671_v59 = vadd.f32 %v1799_v53, %v527_v55  ;;  %v1800_v60 = vpop.f32.mrb[30].mxu0  ;;  %v912_v44 = vpop.permute.xlu1 %911 }
 0x144   : > { %v1801_v61 = vpop.f32.mrb[31].mxu0  ;;  %v907_v45 = vpop.permute.xlu0 %906 }
 0x145   : > { %v1880_v62 = vpop.f32.mrb[30].mxu1  ;;  %v816_v63 = vadd.f32 %v1879_v56, %v671_v59  ;;  %v1802_v0 = vadd.f32 %v1801_v61, %v1800_v60  ;;  %v2179_v2 = vpack.c.bf16 %v837_v58, %v836_v57 }
 0x146   : > { %v1881_v1 = vpop.f32.mrb[31].mxu1 }
 0x147   : > { %v1882_v4 = vadd.f32 %v1881_v1, %v1880_v62  ;;  %v676_v5 = vadd.f32 %v1802_v0, %v532_v3  ;;  %2180 = vmatprep.subr.bf16.mxu0 %v2179_v2  ;;  %v838_v7 = vmax.f32 %v816_v63, 0.0  ;;  %v2888_v46 = vpop.permute.xlu1 %1001 }
 0x148   : > { %2182 = vmatpush3.bf16.msra.mxu0 %v2179_v2  ;;  %v2890_v47 = vpop.permute.xlu0 %996 }
 0x149   : > { %v821_v6 = vadd.f32 %v1882_v4, %v676_v5 }
 0x14b   : > { %v839_v8 = vmax.f32 %v821_v6, 0.0  ;;  %v922_v48 = vpop.permute.xlu1 %921 }
 0x14c   : > { %v917_v49 = vpop.permute.xlu0 %916 }
 0x14d   : > { %v2183_v9 = vpack.c.bf16 %v839_v8, %v838_v7 }
 0x14f   : > { %2184 = vmatprep.subr.bf16.mxu0 %v2183_v9  ;;  %v2892_v50 = vpop.permute.xlu1 %1011 }
 0x150   : > { %2186 = vmatpush3.bf16.msra.mxu0 %v2183_v9  ;;  %v2894_v51 = vpop.permute.xlu0 %1006 }
 0x153   : > { %2044 = vmatmul.mubr.f32.vlgmr.msra.gmra.mrb[32].mxu0 %v841_v10  ;;  %v932_v52 = vpop.permute.xlu1 %931 }
 0x154   : > { %2046 = vmatprep.mubr.f32.mxu0 %v842_v11  ;;  %v927_v53 = vpop.permute.xlu0 %926 }
 0x157   : > { %2047 = vmatmul.mubr.f32.gmra.mrb[34].mxu0 %v843_v12  ;;  %v2896_v54 = vpop.permute.xlu1 %1021 }
 0x158   : > { %2049 = vmatprep.mubr.f32.mxu0 %v844_v13  ;;  %v2898_v55 = vpop.permute.xlu0 %1016 }
 0x15b   : > { %2050 = vmatmul.mubr.f32.gmra.mrb[36].mxu0 %v845_v14  ;;  %v942_v56 = vpop.permute.xlu1 %941 }
 0x15c   : > { %2052 = vmatprep.mubr.f32.mxu0 %v846_v15  ;;  %v937_v57 = vpop.permute.xlu0 %936 }
 0x15f   : > { %2053 = vmatmul.mubr.f32.gmra.mrb[38].mxu0 %v847_v16  ;;  %v2900_v58 = vpop.permute.xlu1 %1031 }
 0x160   : > { %2055 = vmatprep.mubr.f32.mxu0 %v848_v17  ;;  %v2902_v59 = vpop.permute.xlu0 %1026 }
 0x163   : > { %2056 = vmatmul.mubr.f32.gmra.mrb[40].mxu0 %v849_v18  ;;  %v952_v60 = vpop.permute.xlu1 %951 }
 0x164   : > { %2058 = vmatprep.mubr.f32.mxu0 %v850_v19  ;;  %v947_v61 = vpop.permute.xlu0 %946 }
 0x167   : > { %2059 = vmatmul.mubr.f32.gmra.mrb[42].mxu0 %v851_v20  ;;  %v2904_v62 = vpop.permute.xlu1 %1041 }
 0x168   : > { %2061 = vmatprep.mubr.f32.mxu0 %v852_v21  ;;  %v2906_v63 = vpop.permute.xlu0 %1036 }
 0x16b   : > { %2062 = vmatmul.mubr.f32.gmra.mrb[44].mxu0 %v853_v22  ;;  %v962_v5 = vpop.permute.xlu1 %961 }
 0x16c   : > { %2064 = vmatprep.mubr.f32.mxu0 %v854_v23  ;;  %v957_v8 = vpop.permute.xlu0 %956 }
 0x16f   : > { %2065 = vmatmul.mubr.f32.gmra.mrb[46].mxu0 %v855_v24  ;;  %v2910_v18 = vpop.permute.xlu1 %1051 }
 0x170   : > { %2067 = vmatprep.mubr.f32.mxu0 %v856_v25  ;;  %v2914_v21 = vpop.permute.xlu0 %1046 }
 0x173   : > { %2068 = vmatmul.mubr.f32.gmra.mrb[48].mxu0 %v857_v26 }
 0x174   : > { %2070 = vmatprep.mubr.f32.mxu0 %v858_v27 }
 0x177   : > { %2071 = vmatmul.mubr.f32.gmra.mrb[50].mxu0 %v859_v28 }
 0x178   : > { %2073 = vmatprep.mubr.f32.mxu0 %v860_v29 }
 0x17b   : > { %2074 = vmatmul.mubr.f32.gmra.mrb[52].mxu0 %v861_v30  ;;  %v972_v30 = vpop.permute.xlu1 %971 }
 0x17c   : > { %2076 = vmatprep.mubr.f32.mxu0 %v862_v31 }
 0x17f   : > { %2077 = vmatmul.mubr.f32.gmra.mrb[54].mxu0 %v863_v32 }
 0x180   : > { %2079 = vmatprep.mubr.f32.mxu0 %v864_v33  ;;  %v967_v33 = vpop.permute.xlu0 %966 }
 0x183   : > { %2080 = vmatmul.mubr.f32.gmra.mrb[56].mxu0 %v865_v34 }
 0x184   : > { %2082 = vmatprep.mubr.f32.mxu0 %v866_v35 }
 0x187   : > { %2083 = vmatmul.mubr.f32.gmra.mrb[58].mxu0 %v867_v36 }
 0x188   : > { %2085 = vmatprep.mubr.f32.mxu0 %v868_v37 }
 0x18b   : > { %2086 = vmatmul.mubr.f32.gmra.mrb[60].mxu0 %v869_v38 }
 0x18c   : > { %2088 = vmatprep.mubr.f32.mxu0 %v870_v39 }
 0x18f   : > { %2089 = vmatmul.mubr.f32.gmra.mrb[62].mxu0 %v871_v40 }
 0x226   : > { %v2045_v0 = vpop.f32.mrb[32].mxu0 }
 0x227   : > { %v1136_v1 = vadd.f32 %v2045_v0, %v912_v44  ;;  %v1130_v2 = vpop.f32.mrb[33].mxu0 }
 0x228   : > { %v1131_v3 = vadd.f32 %v1130_v2, %v907_v45  ;;  %v2920_v45 = vpop.permute.xlu1 %1061 }
 0x229   : > { %v1290_v4 = vmax.f32 %v1136_v1, 0.0 }
 0x22a   : > { %v1289_v6 = vmax.f32 %v1131_v3, 0.0  ;;  %v2048_v7 = vpop.f32.mrb[34].mxu0 }
 0x22b   : > { %v1146_v9 = vadd.f32 %v2048_v7, %v922_v48  ;;  %v1140_v10 = vpop.f32.mrb[35].mxu0 }
 0x22c   : > { %v2908_v11 = vpack.c.bf16 %v1290_v4, %v1289_v6  ;;  %v1141_v12 = vadd.f32 %v1140_v10, %v917_v49  ;;  %v982_v3 = vpop.permute.xlu1 %981 }
 0x22d   : > { %v1292_v13 = vmax.f32 %v1146_v9, 0.0 }
 0x22e   : > { %v1291_v14 = vmax.f32 %v1141_v12, 0.0  ;;  %v2051_v15 = vpop.f32.mrb[36].mxu0 }
 0x22f   : > { %v1156_v16 = vadd.f32 %v2051_v15, %v932_v52  ;;  %v1150_v17 = vpop.f32.mrb[37].mxu0  ;;  %v2924_v52 = vpop.permute.xlu0 %1056 }
 0x230   : > { %v2912_v19 = vpack.c.bf16 %v1292_v13, %v1291_v14  ;;  %v1151_v20 = vadd.f32 %v1150_v17, %v927_v53 }
 0x231   : > { %v1294_v22 = vmax.f32 %v1156_v16, 0.0 }
 0x232   : > { %v1293_v23 = vmax.f32 %v1151_v20, 0.0  ;;  %v2054_v24 = vpop.f32.mrb[38].mxu0 }
 0x233   : > { %v1166_v25 = vadd.f32 %v2054_v24, %v942_v56  ;;  %v1160_v26 = vpop.f32.mrb[39].mxu0  ;;  %v977_v6 = vpop.permute.xlu0 %976 }
 0x234   : > { %v2916_v27 = vpack.c.bf16 %v1294_v22, %v1293_v23  ;;  %v1161_v28 = vadd.f32 %v1160_v26, %v937_v57 }
 0x235   : > { %v1296_v29 = vmax.f32 %v1166_v25, 0.0 }
 0x236   : > { %v1295_v31 = vmax.f32 %v1161_v28, 0.0  ;;  %v2057_v32 = vpop.f32.mrb[40].mxu0 }
 0x237   : > { %v1176_v34 = vadd.f32 %v2057_v32, %v952_v60  ;;  %v1170_v35 = vpop.f32.mrb[41].mxu0 }
 0x238   : > { %v2918_v36 = vpack.c.bf16 %v1296_v29, %v1295_v31  ;;  %v1171_v37 = vadd.f32 %v1170_v35, %v947_v61 }
 0x239   : > { %v1298_v38 = vmax.f32 %v1176_v34, 0.0 }
 0x23a   : > { %v1297_v39 = vmax.f32 %v1171_v37, 0.0  ;;  %v2060_v40 = vpop.f32.mrb[42].mxu0 }
 0x23b   : > { %v1186_v43 = vadd.f32 %v2060_v40, %v962_v5  ;;  %v1180_v44 = vpop.f32.mrb[43].mxu0 }
 0x23c   : > { %v2922_v48 = vpack.c.bf16 %v1298_v38, %v1297_v39  ;;  %v1181_v49 = vadd.f32 %v1180_v44, %v957_v8 }
 0x23d   : > { %v1300_v53 = vmax.f32 %v1186_v43, 0.0 }
 0x23e   : > { %v1299_v56 = vmax.f32 %v1181_v49, 0.0  ;;  %v2063_v57 = vpop.f32.mrb[44].mxu0 }
 0x23f   : > { %v1196_v60 = vadd.f32 %v2063_v57, %v972_v30  ;;  %v1190_v0 = vpop.f32.mrb[45].mxu0 }
 0x240   : > { %v2926_v1 = vpack.c.bf16 %v1300_v53, %v1299_v56  ;;  %v1191_v61 = vadd.f32 %v1190_v0, %v967_v33 }
 0x241   : > { %v1302_v2 = vmax.f32 %v1196_v60, 0.0 }
 0x242   : > { %v1301_v4 = vmax.f32 %v1191_v61, 0.0  ;;  %v2066_v5 = vpop.f32.mrb[46].mxu0 }
 0x243   : > { %v1206_v7 = vadd.f32 %v2066_v5, %v982_v3  ;;  %v1200_v9 = vpop.f32.mrb[47].mxu0 }
 0x244   : > { %v2928_v10 = vpack.c.bf16 %v1302_v2, %v1301_v4  ;;  %v1201_v8 = vadd.f32 %v1200_v9, %v977_v6 }
 0x245   : > { %v1304_v12 = vmax.f32 %v1206_v7, 0.0 }
 0x246   : > { %v1303_v13 = vmax.f32 %v1201_v8, 0.0  ;;  %v2069_v14 = vpop.f32.mrb[48].mxu0 }
 0x247   : > { %v1216_v15 = vadd.f32 %v2069_v14, %v2881_v41  ;;  %v1210_v16 = vpop.f32.mrb[49].mxu0  ;;  %v1330_v14 = vld [vmem:[%s3101_s5 + $0x48] sm:$0xff] }
 0x248   : > { %v2931_v17 = vpack.c.bf16 %v1304_v12, %v1303_v13  ;;  %v1211_v20 = vadd.f32 %v1210_v16, %v2883_v42  ;;  %v1328_v12 = vld [vmem:[%s3101_s5 + $0x38] sm:$0xff]  ;;  %v1327_v13 = vld [vmem:[%s3101_s5 + $0x30] sm:$0xff] }
 0x249   : > { %v1306_v22 = vmax.f32 %v1216_v15, 0.0  ;;  %v1329_v15 = vld [vmem:[%s3101_s5 + $0x40] sm:$0xff]  ;;  %v1332_v16 = vld [vmem:[%s3101_s5 + $0x58] sm:$0xff] }
 0x24a   : > { %v1305_v23 = vmax.f32 %v1211_v20, 0.0  ;;  %v2072_v24 = vpop.f32.mrb[50].mxu0  ;;  %v1334_v20 = vld [vmem:[%s3101_s5 + $0x68] sm:$0xff] }
 0x24b   : > { %v1226_v25 = vadd.f32 %v2072_v24, %v2888_v46  ;;  %v1220_v26 = vpop.f32.mrb[51].mxu0  ;;  %v1335_v24 = vld [vmem:[%s3101_s5 + $0x70] sm:$0xff] }
 0x24c   : > { %v2187_v28 = vpack.c.bf16 %v1306_v22, %v1305_v23  ;;  %v1221_v29 = vadd.f32 %v1220_v26, %v2890_v47  ;;  %v1333_v22 = vld [vmem:[%s3101_s5 + $0x60] sm:$0xff]  ;;  %v1336_v23 = vld [vmem:[%s3101_s5 + $0x78] sm:$0xff] }
 0x24d   : > { %v1308_v30 = vmax.f32 %v1226_v25, 0.0  ;;  %v1338_v25 = vld [vmem:[%s3101_s5 + $0x88] sm:$0xff]  ;;  %v1337_v26 = vld [vmem:[%s3101_s5 + $0x80] sm:$0xff] }
 0x24e   : > { %v1307_v31 = vmax.f32 %v1221_v29, 0.0  ;;  %v2075_v32 = vpop.f32.mrb[52].mxu0  ;;  %2188 = vmatprep.subr.bf16.mxu1 %v2187_v28  ;;  %v1340_v28 = vld [vmem:[%s3101_s5 + $0x98] sm:$0xff]  ;;  %v1339_v29 = vld [vmem:[%s3101_s5 + $0x90] sm:$0xff] }
 0x24f   : > { %v1236_v41 = vadd.f32 %v2075_v32, %v2892_v50  ;;  %v1230_v33 = vpop.f32.mrb[53].mxu0  ;;  %2190 = vmatpush3.bf16.msra.mxu1 %v2908_v11  ;;  %v1344_v32 = vld [vmem:[%s3101_s5 + $0xb8] sm:$0xff] }
 0x250   : > { %v2191_v34 = vpack.c.bf16 %v1308_v30, %v1307_v31  ;;  %v1231_v42 = vadd.f32 %v1230_v33, %v2894_v51  ;;  %v1342_v30 = vld [vmem:[%s3101_s5 + $0xa8] sm:$0xff]  ;;  %v1341_v31 = vld [vmem:[%s3101_s5 + $0xa0] sm:$0xff] }
 0x251   : > { %v1310_v35 = vmax.f32 %v1236_v41, 0.0  ;;  %v1343_v41 = vld [vmem:[%s3101_s5 + $0xb0] sm:$0xff]  ;;  %v1346_v33 = vld [vmem:[%s3101_s5 + $0xc8] sm:$0xff] }
 0x252   : > { %v1309_v37 = vmax.f32 %v1231_v42, 0.0  ;;  %v2078_v38 = vpop.f32.mrb[54].mxu0  ;;  %2192 = vmatprep.subr.bf16.mxu1 %v2191_v34  ;;  %v1345_v34 = vld [vmem:[%s3101_s5 + $0xc0] sm:$0xff]  ;;  %v1348_v42 = vld [vmem:[%s3101_s5 + $0xd8] sm:$0xff] }
 0x253   : > { %v1246_v46 = vadd.f32 %v2078_v38, %v2896_v54  ;;  %v1240_v39 = vpop.f32.mrb[55].mxu0  ;;  %2194 = vmatpush3.bf16.msra.mxu1 %v2912_v19  ;;  %v1349_v38 = vld [vmem:[%s3101_s5 + $0xe0] sm:$0xff] }
 0x254   : > { %v2195_v47 = vpack.c.bf16 %v1310_v35, %v1309_v37  ;;  %v1241_v40 = vadd.f32 %v1240_v39, %v2898_v55  ;;  %v1347_v35 = vld [vmem:[%s3101_s5 + $0xd0] sm:$0xff]  ;;  %v1350_v37 = vld [vmem:[%s3101_s5 + $0xe8] sm:$0xff] }
 0x255   : > { %v1312_v43 = vmax.f32 %v1246_v46, 0.0  ;;  %v1352_v46 = vld [vmem:[%s3101_s5 + $0xf8] sm:$0xff]  ;;  %v1351_v39 = vld [vmem:[%s3101_s5 + $0xf0] sm:$0xff] }
 0x256   : > { %v1311_v50 = vmax.f32 %v1241_v40, 0.0  ;;  %v2081_v44 = vpop.f32.mrb[56].mxu0  ;;  %2196 = vmatprep.subr.bf16.mxu1 %v2195_v47 }
 0x257   : > { %v1256_v11 = vadd.f32 %v2081_v44, %v2900_v58  ;;  %v1250_v49 = vpop.f32.mrb[57].mxu0  ;;  %2198 = vmatpush3.bf16.msra.mxu1 %v2916_v27 }
 0x258   : > { %v2199_v51 = vpack.c.bf16 %v1312_v43, %v1311_v50  ;;  %v1251_v53 = vadd.f32 %v1250_v49, %v2902_v59  ;;  %v1372_v50 = vpop.permute.xlu0 %1371 }
 0x259   : > { %v1314_v56 = vmax.f32 %v1256_v11, 0.0 }
 0x25a   : > { %v1313_v54 = vmax.f32 %v1251_v53, 0.0  ;;  %v2084_v57 = vpop.f32.mrb[58].mxu0  ;;  %2200 = vmatprep.subr.bf16.mxu1 %v2199_v51 }
 0x25b   : > { %v1266_v19 = vadd.f32 %v2084_v57, %v2904_v62  ;;  %v1260_v60 = vpop.f32.mrb[59].mxu0  ;;  %2202 = vmatpush3.bf16.msra.mxu1 %v2918_v36 }
 0x25c   : > { %v2203_v55 = vpack.c.bf16 %v1314_v56, %v1313_v54  ;;  %v1261_v0 = vadd.f32 %v1260_v60, %v2906_v63  ;;  %v1377_v56 = vpop.permute.xlu1 %1376 }
 0x25d   : > { %v1316_v61 = vmax.f32 %v1266_v19, 0.0 }
 0x25e   : > { %v1315_v58 = vmax.f32 %v1261_v0, 0.0  ;;  %v2087_v2 = vpop.f32.mrb[60].mxu0  ;;  %2204 = vmatprep.subr.bf16.mxu1 %v2203_v55  ;;  %v1382_v0 = vpop.permute.xlu0 %1381 }
 0x25f   : > { %v1276_v27 = vadd.f32 %v2087_v2, %v2910_v18  ;;  %v1270_v3 = vpop.f32.mrb[61].mxu0  ;;  %2206 = vmatpush3.bf16.msra.mxu1 %v2922_v48 }
 0x260   : > { %v2207_v59 = vpack.c.bf16 %v1316_v61, %v1315_v58  ;;  %v1271_v4 = vadd.f32 %v1270_v3, %v2914_v21  ;;  %v1321_v21 = vld [vmem:[%s3101_s5] sm:$0xff] }
 0x261   : > { %v1318_v5 = vmax.f32 %v1276_v27, 0.0 }
 0x262   : > { %v1317_v62 = vmax.f32 %v1271_v4, 0.0  ;;  %v2090_v6 = vpop.f32.mrb[62].mxu0  ;;  %2208 = vmatprep.subr.bf16.mxu1 %v2207_v59  ;;  %v1387_v59 = vpop.permute.xlu1 %1386 }
 0x263   : > { %v1286_v36 = vadd.f32 %v2090_v6, %v2920_v45  ;;  %v1280_v7 = vpop.f32.mrb[63].mxu0  ;;  %2210 = vmatpush3.bf16.msra.mxu1 %v2926_v1  ;;  %v1324_v45 = vld [vmem:[%s3101_s5 + $0x18] sm:$0xff]  ;;  %v1326_v1 = vld [vmem:[%s3101_s5 + $0x28] sm:$0xff] }
 0x264   : > { %v2211_v63 = vpack.c.bf16 %v1318_v5, %v1317_v62  ;;  %v1281_v9 = vadd.f32 %v1280_v7, %v2924_v52  ;;  %v1323_v52 = vld [vmem:[%s3101_s5 + $0x10] sm:$0xff]  ;;  %v1392_v7 = vpop.permute.xlu0 %1391 }
 0x265   : > { %v1320_v8 = vmax.f32 %v1286_v36, 0.0 }
 0x266   : > { %v1319_v18 = vmax.f32 %v1281_v9, 0.0  ;;  %2212 = vmatprep.subr.bf16.mxu1 %v2211_v63 }
 0x267   : > { %2214 = vmatpush3.bf16.msra.mxu1 %v2928_v10  ;;  %v1325_v10 = vld [vmem:[%s3101_s5 + $0x20] sm:$0xff] }
 0x268   : > { %v2215_v48 = vpack.c.bf16 %v1320_v8, %v1319_v18 }
 0x26a   : > { %2216 = vmatprep.subr.bf16.mxu1 %v2215_v48 }
 0x26b   : > { %2218 = vmatpush3.bf16.msra.mxu1 %v2931_v17  ;;  %v1331_v17 = vld [vmem:[%s3101_s5 + $0x50] sm:$0xff] }
 0x26e   : > { %1514 = vmatmul.mubr.f32.vlgmr.msra.gmra.mrb[32].mxu1 %v1321_v21  ;;  %v1397_v21 = vpop.permute.xlu1 %1396 }
 0x26f   : > { %1518 = vmatprep.mubr.f32.mxu1 %v1324_v45 }
 0x272   : > { %1519 = vmatmul.mubr.f32.gmra.mrb[34].mxu1 %v1323_v52 }
 0x273   : > { %1523 = vmatprep.mubr.f32.mxu1 %v1326_v1 }
 0x276   : > { %1524 = vmatmul.mubr.f32.gmra.mrb[36].mxu1 %v1325_v10 }
 0x277   : > { %1528 = vmatprep.mubr.f32.mxu1 %v1328_v12 }
 0x27a   : > { %1529 = vmatmul.mubr.f32.gmra.mrb[38].mxu1 %v1327_v13  ;;  %v1402_v13 = vpop.permute.xlu0 %1401 }
 0x27b   : > { %1533 = vmatprep.mubr.f32.mxu1 %v1330_v14 }
 0x27e   : > { %1534 = vmatmul.mubr.f32.gmra.mrb[40].mxu1 %v1329_v15 }
 0x27f   : > { %1538 = vmatprep.mubr.f32.mxu1 %v1332_v16 }
 0x282   : > { %1539 = vmatmul.mubr.f32.gmra.mrb[42].mxu1 %v1331_v17 }
 0x283   : > { %1543 = vmatprep.mubr.f32.mxu1 %v1334_v20 }
 0x286   : > { %1544 = vmatmul.mubr.f32.gmra.mrb[44].mxu1 %v1333_v22  ;;  %v1407_v22 = vpop.permute.xlu1 %1406 }
 0x287   : > { %1548 = vmatprep.mubr.f32.mxu1 %v1336_v23 }
 0x28a   : > { %1549 = vmatmul.mubr.f32.gmra.mrb[46].mxu1 %v1335_v24 }
 0x28b   : > { %1553 = vmatprep.mubr.f32.mxu1 %v1338_v25 }
 0x28e   : > { %1554 = vmatmul.mubr.f32.gmra.mrb[48].mxu1 %v1337_v26 }
 0x28f   : > { %1558 = vmatprep.mubr.f32.mxu1 %v1340_v28 }
 0x292   : > { %1559 = vmatmul.mubr.f32.gmra.mrb[50].mxu1 %v1339_v29  ;;  %v1412_v29 = vpop.permute.xlu0 %1411 }
 0x293   : > { %1563 = vmatprep.mubr.f32.mxu1 %v1342_v30 }
 0x296   : > { %1564 = vmatmul.mubr.f32.gmra.mrb[52].mxu1 %v1341_v31 }
 0x297   : > { %1568 = vmatprep.mubr.f32.mxu1 %v1344_v32 }
 0x29a   : > { %1569 = vmatmul.mubr.f32.gmra.mrb[54].mxu1 %v1343_v41 }
 0x29b   : > { %1573 = vmatprep.mubr.f32.mxu1 %v1346_v33 }
 0x29e   : > { %1574 = vmatmul.mubr.f32.gmra.mrb[56].mxu1 %v1345_v34  ;;  %v1417_v34 = vpop.permute.xlu1 %1416 }
 0x29f   : > { %1578 = vmatprep.mubr.f32.mxu1 %v1348_v42 }
 0x2a2   : > { %1579 = vmatmul.mubr.f32.gmra.mrb[58].mxu1 %v1347_v35 }
 0x2a3   : > { %1583 = vmatprep.mubr.f32.mxu1 %v1350_v37 }
 0x2a6   : > { %1584 = vmatmul.mubr.f32.gmra.mrb[60].mxu1 %v1349_v38 }
 0x2a7   : > { %1588 = vmatprep.mubr.f32.mxu1 %v1352_v46 }
 0x2aa   : > { %1589 = vmatmul.mubr.f32.gmra.mrb[62].mxu1 %v1351_v39  ;;  %v1422_v39 = vpop.permute.xlu0 %1421 }
 0x341   : > { %v1963_v47 = vpop.f32.mrb[32].mxu1 }
 0x342   : > { %v1964_v40 = vpop.f32.mrb[33].mxu1 }
 0x343   : > { %v1965_v43 = vadd.f32 %v1964_v40, %v1963_v47 }
 0x345   : > { %v1516_v44 = vadd.f32 %v1965_v43, %v1372_v50  ;;  %v1966_v11 = vpop.f32.mrb[34].mxu1 }
 0x346   : > { %v1967_v49 = vpop.f32.mrb[35].mxu1 }
 0x347   : > { %v1594_v51 = vmax.f32 %v1516_v44, 0.0  ;;  %v1968_v53 = vadd.f32 %v1967_v49, %v1966_v11  ;;  %v1427_v11 = vpop.permute.xlu1 %1426 }
 0x349   : > { %1611 = vst.msk [vmem:[%s3053_s16] sm:$0xff] %vm1610_vm0, %v1594_v51  ;;  %v1521_v54 = vadd.f32 %v1968_v53, %v1377_v56  ;;  %v1969_v57 = vpop.f32.mrb[36].mxu1 }
 0x34a   : > { %v1970_v19 = vpop.f32.mrb[37].mxu1 }
 0x34b   : > { %v1595_v60 = vmax.f32 %v1521_v54, 0.0  ;;  %v1971_v55 = vadd.f32 %v1970_v19, %v1969_v57  ;;  %v1432_v57 = vpop.permute.xlu0 %1431 }
 0x34d   : > { %1612 = vst.msk [vmem:[%s3053_s16 + $0x8] sm:$0xff] %vm1610_vm0, %v1595_v60  ;;  %v1526_v61 = vadd.f32 %v1971_v55, %v1382_v0  ;;  %v1972_v58 = vpop.f32.mrb[38].mxu1 }
 0x34e   : > { %v1973_v2 = vpop.f32.mrb[39].mxu1 }
 0x34f   : > { %v1596_v27 = vmax.f32 %v1526_v61, 0.0  ;;  %v1974_v3 = vadd.f32 %v1973_v2, %v1972_v58  ;;  %v1437_v58 = vpop.permute.xlu1 %1436 }
 0x351   : > { %1613 = vst.msk [vmem:[%s3053_s16 + $0x10] sm:$0xff] %vm1610_vm0, %v1596_v27  ;;  %v1531_v4 = vadd.f32 %v1974_v3, %v1387_v59  ;;  %v1975_v5 = vpop.f32.mrb[40].mxu1 }
 0x352   : > { %v1976_v62 = vpop.f32.mrb[41].mxu1 }
 0x353   : > { %v1597_v6 = vmax.f32 %v1531_v4, 0.0  ;;  %v1977_v36 = vadd.f32 %v1976_v62, %v1975_v5  ;;  %v1442_v5 = vpop.permute.xlu0 %1441 }
 0x355   : > { %1614 = vst.msk [vmem:[%s3053_s16 + $0x18] sm:$0xff] %vm1610_vm0, %v1597_v6  ;;  %v1536_v63 = vadd.f32 %v1977_v36, %v1392_v7  ;;  %v1978_v9 = vpop.f32.mrb[42].mxu1 }
 0x356   : > { %v1979_v8 = vpop.f32.mrb[43].mxu1 }
 0x357   : > { %v1598_v18 = vmax.f32 %v1536_v63, 0.0  ;;  %v1980_v48 = vadd.f32 %v1979_v8, %v1978_v9  ;;  %v1447_v9 = vpop.permute.xlu1 %1446 }
 0x359   : > { %1615 = vst.msk [vmem:[%s3053_s16 + $0x20] sm:$0xff] %vm1610_vm0, %v1598_v18  ;;  %v1541_v45 = vadd.f32 %v1980_v48, %v1397_v21  ;;  %v1981_v52 = vpop.f32.mrb[44].mxu1 }
 0x35a   : > { %v1982_v1 = vpop.f32.mrb[45].mxu1 }
 0x35b   : > { %v1599_v10 = vmax.f32 %v1541_v45, 0.0  ;;  %v1983_v12 = vadd.f32 %v1982_v1, %v1981_v52 }
 0x35d   : > { %1616 = vst.msk [vmem:[%s3053_s16 + $0x28] sm:$0xff] %vm1610_vm0, %v1599_v10  ;;  %v1546_v14 = vadd.f32 %v1983_v12, %v1402_v13  ;;  %v1984_v15 = vpop.f32.mrb[46].mxu1 }
 0x35e   : > { %v1985_v16 = vpop.f32.mrb[47].mxu1 }
 0x35f   : > { %v1600_v17 = vmax.f32 %v1546_v14, 0.0  ;;  %v1986_v20 = vadd.f32 %v1985_v16, %v1984_v15 }
 0x361   : > { %1617 = vst.msk [vmem:[%s3053_s16 + $0x30] sm:$0xff] %vm1610_vm0, %v1600_v17  ;;  %v1551_v23 = vadd.f32 %v1986_v20, %v1407_v22  ;;  %v1987_v24 = vpop.f32.mrb[48].mxu1 }
 0x362   : > { %v1988_v25 = vpop.f32.mrb[49].mxu1 }
 0x363   : > { %v1601_v26 = vmax.f32 %v1551_v23, 0.0  ;;  %v1989_v28 = vadd.f32 %v1988_v25, %v1987_v24 }
 0x365   : > { %1618 = vst.msk [vmem:[%s3053_s16 + $0x38] sm:$0xff] %vm1610_vm0, %v1601_v26  ;;  %v1556_v30 = vadd.f32 %v1989_v28, %v1412_v29  ;;  %v1990_v31 = vpop.f32.mrb[50].mxu1 }
 0x366   : > { %v1991_v32 = vpop.f32.mrb[51].mxu1 }
 0x367   : > { %v1602_v41 = vmax.f32 %v1556_v30, 0.0  ;;  %v1992_v33 = vadd.f32 %v1991_v32, %v1990_v31 }
 0x369   : > { %1619 = vst.msk [vmem:[%s3053_s16 + $0x40] sm:$0xff] %vm1610_vm0, %v1602_v41  ;;  %v1561_v42 = vadd.f32 %v1992_v33, %v1417_v34  ;;  %v1993_v35 = vpop.f32.mrb[52].mxu1 }
 0x36a   : > { %v1994_v37 = vpop.f32.mrb[53].mxu1 }
 0x36b   : > { %v1603_v38 = vmax.f32 %v1561_v42, 0.0  ;;  %v1995_v46 = vadd.f32 %v1994_v37, %v1993_v35 }
 0x36d   : > { %1620 = vst.msk [vmem:[%s3053_s16 + $0x48] sm:$0xff] %vm1610_vm0, %v1603_v38  ;;  %v1566_v47 = vadd.f32 %v1995_v46, %v1422_v39  ;;  %v1996_v40 = vpop.f32.mrb[54].mxu1 }
 0x36e   : > { %v1997_v43 = vpop.f32.mrb[55].mxu1 }
 0x36f   : > { %v1604_v50 = vmax.f32 %v1566_v47, 0.0  ;;  %v1998_v44 = vadd.f32 %v1997_v43, %v1996_v40 }
 0x371   : > { %1621 = vst.msk [vmem:[%s3053_s16 + $0x50] sm:$0xff] %vm1610_vm0, %v1604_v50  ;;  %v1571_v49 = vadd.f32 %v1998_v44, %v1427_v11  ;;  %v1999_v51 = vpop.f32.mrb[56].mxu1 }
 0x372   : > { %v2000_v53 = vpop.f32.mrb[57].mxu1 }
 0x373   : > { %v1605_v56 = vmax.f32 %v1571_v49, 0.0  ;;  %v2001_v54 = vadd.f32 %v2000_v53, %v1999_v51 }
 0x375   : > { %1622 = vst.msk [vmem:[%s3053_s16 + $0x58] sm:$0xff] %vm1610_vm0, %v1605_v56  ;;  %v1576_v19 = vadd.f32 %v2001_v54, %v1432_v57  ;;  %v2002_v60 = vpop.f32.mrb[58].mxu1 }
 0x376   : > { %v2003_v55 = vpop.f32.mrb[59].mxu1 }
 0x377   : > { %v1606_v0 = vmax.f32 %v1576_v19, 0.0  ;;  %v2004_v61 = vadd.f32 %v2003_v55, %v2002_v60 }
 0x379   : > { %1623 = vst.msk [vmem:[%s3053_s16 + $0x60] sm:$0xff] %vm1610_vm0, %v1606_v0  ;;  %v1581_v2 = vadd.f32 %v2004_v61, %v1437_v58  ;;  %v2005_v27 = vpop.f32.mrb[60].mxu1 }
 0x37a   : > { %v2006_v3 = vpop.f32.mrb[61].mxu1 }
 0x37b   : > { %v1607_v59 = vmax.f32 %v1581_v2, 0.0  ;;  %v2007_v4 = vadd.f32 %v2006_v3, %v2005_v27 }
 0x37d   : > { %1624 = vst.msk [vmem:[%s3053_s16 + $0x68] sm:$0xff] %vm1610_vm0, %v1607_v59  ;;  %v1586_v62 = vadd.f32 %v2007_v4, %v1442_v5  ;;  %v2008_v6 = vpop.f32.mrb[62].mxu1 }
 0x37e   : > { %v2009_v36 = vpop.f32.mrb[63].mxu1 }
 0x37f   : > { %v1608_v7 = vmax.f32 %v1586_v62, 0.0  ;;  %v2010_v63 = vadd.f32 %v2009_v36, %v2008_v6 }
 0x381   : > { %1625 = vst.msk [vmem:[%s3053_s16 + $0x70] sm:$0xff] %vm1610_vm0, %v1608_v7  ;;  %v1591_v8 = vadd.f32 %v2010_v63, %v1447_v9 }
 0x383   : > { %v1609_v18 = vmax.f32 %v1591_v8, 0.0 }
 0x385   : > { %1626 = vst.msk [vmem:[%s3053_s16 + $0x78] sm:$0xff] %vm1610_vm0, %v1609_v18 }
 0x386 PF: > { %s17_s26 = sadd.s32 1, %s2268_s26   ;;  %s3104_s24 = smov %s2264_s25 }
 0x387   : > { %p14_p5 = scmp.ge.s32.totalorder %s17_s26, 4   ;;  %s3105_s25 = smov %s3107_s27 }
 0x389   :  { %16 = sbr.rel (!%p14_p5) target bundleno = 2 (0x2), region = 78 }

</bundles_post_ra>
